<compile_context>
chip_gen: v6e
topology: v6e:2x2x1
jax: 0.10.0
libtpu: 0.0.40
codegen_flags: <defaults>
</compile_context>

<pallas_src>
import functools

import jax
import jax.numpy as jnp
import numpy as np
from jax.experimental import pallas as pl
from jax.experimental.pallas import tpu as pltpu


# ----------------------------------------------------------------- kernel ----
def _fused_forward_kernel(x_ref, w_ref, b_ref, fcw_ref, fcb_ref, o_ref,
                          *, H, W, K, C):
    """Fused (normalizer-folded) conv3x3 + bias + ReLU + GAP + FC for one image.

    x_ref  : (1, H+2p, W+2p, C)  raw image, spatially padded with per-channel mean
    w_ref  : (K*K, C, F)         conv weight with 1/std folded into channel axis
    b_ref  : (1, F)              conv bias with -sum(w*mean/std) folded in
    fcw_ref: (F, NC)             classifier weight (pre-transposed)
    fcb_ref: (1, NC)             classifier bias
    o_ref  : (1, 1, NC)          logits for this batch element
    """
    F = w_ref.shape[2]
    acc = jnp.zeros((H * W, F), jnp.float32)
    # In-kernel im2col: 9 shifted-slice matmuls accumulating in f32.
    for ki in range(K):
        for kj in range(K):
            patch = x_ref[0, ki:ki + H, kj:kj + W, :].reshape(H * W, C)
            wk = w_ref[ki * K + kj]                                   # (C, F)
            acc = acc + jnp.dot(patch, wk, preferred_element_type=jnp.float32)
    y = jnp.maximum(acc + b_ref[...], 0.0)            # fused bias + ReLU
    pooled = jnp.mean(y, axis=0, keepdims=True)       # global average pool (1, F)
    logits = jnp.dot(pooled, fcw_ref[...],
                     preferred_element_type=jnp.float32) + fcb_ref[...]
    o_ref[0] = logits


def fused_forward(xp, w_folded, b_folded, fc_w_t, fc_b, *, H, W, K, C):
    B, Hp, Wp, _ = xp.shape
    F = w_folded.shape[2]
    NC = fc_w_t.shape[1]
    kernel = functools.partial(_fused_forward_kernel, H=H, W=W, K=K, C=C)
    out = pl.pallas_call(
        kernel,
        out_shape=jax.ShapeDtypeStruct((B, 1, NC), jnp.float32),
        grid=(B,),
        in_specs=[
            pl.BlockSpec((1, Hp, Wp, C), lambda b: (b, 0, 0, 0)),
            pl.BlockSpec((K * K, C, F), lambda b: (0, 0, 0)),
            pl.BlockSpec((1, F), lambda b: (0, 0)),
            pl.BlockSpec((F, NC), lambda b: (0, 0)),
            pl.BlockSpec((1, NC), lambda b: (0, 0)),
        ],
        out_specs=pl.BlockSpec((1, 1, NC), lambda b: (b, 0, 0)),
        compiler_params=pltpu.CompilerParams(
            dimension_semantics=("parallel",)),
    )(xp, w_folded, b_folded, fc_w_t, fc_b)
    return out[:, 0, :]


# ---------------------------------------------------- params & forward -------
def init_params(key, C=4, F=8, K=3, num_classes=10):
    k1, k2, k3, k4 = jax.random.split(key, 4)
    return dict(
        # PyTorch layouts: Conv2d weight [F, C, kH, kW], Linear weight [out, in]
        conv_w=jax.random.normal(k1, (F, C, K, K), jnp.float32) * 0.1,
        conv_b=jax.random.normal(k2, (F,), jnp.float32) * 0.1,
        fc_w=jax.random.normal(k3, (num_classes, F), jnp.float32) * 0.1,
        fc_b=jax.random.normal(k4, (num_classes,), jnp.float32) * 0.1,
        mean=jnp.array([0.485, 0.456, 0.406, 0.500], jnp.float32)[:C],
        std=jnp.array([0.229, 0.224, 0.225, 0.250], jnp.float32)[:C],
    )


def prepare_params(params):
    """One-time parameter folding (done on host, outside the per-step forward):
    fold the normalizer into the conv weights/bias and pre-transpose weights."""
    conv_w = params["conv_w"]                       # (F, C, K, K)
    F, C, K, _ = conv_w.shape
    inv_std = 1.0 / params["std"]                   # (C,)
    mean = params["mean"]                           # (C,)
    w_t = jnp.transpose(conv_w, (2, 3, 1, 0))       # (K, K, C, F)
    w_folded = (w_t * inv_std.reshape(1, 1, C, 1)).reshape(K * K, C, F)
    b_folded = params["conv_b"] - jnp.einsum("ijcf,c->f", w_t, mean * inv_std)
    return dict(
        w_folded=w_folded,                          # (K*K, C, F)
        b_folded=b_folded.reshape(1, F),            # (1, F)
        fc_w_t=params["fc_w"].T,                    # (F, NC)
        fc_b=params["fc_b"].reshape(1, -1),         # (1, NC)
        mean=mean,                                  # (C,) -- needed for border padding
    )


def model_wrapper_forward(prepared, x_nchw):
    """ModelWrapper.forward: x -> normalizer(x) -> model(x) (normalizer folded)."""
    B, C, H, W = x_nchw.shape
    K = int(round((prepared["w_folded"].shape[0]) ** 0.5))
    pad = K // 2

    # NCHW -> NHWC (layout glue)
    x = jnp.transpose(x_nchw, (0, 2, 3, 1)).astype(jnp.float32)

    # Pad spatially with the per-channel mean: (mean - mean)/std == 0, so this is
    # exactly equivalent to zero-padding the normalized input.
    xp = jnp.broadcast_to(prepared["mean"],
                          (B, H + 2 * pad, W + 2 * pad, C)).astype(jnp.float32)
    xp = jax.lax.dynamic_update_slice(xp, x, (0, pad, pad, 0))

    return fused_forward(xp, prepared["w_folded"], prepared["b_folded"],
                         prepared["fc_w_t"], prepared["fc_b"],
                         H=H, W=W, K=K, C=C)


# ------------------------------------------------------------- reference -----
def reference_forward(params, x_nchw):
    mean = params["mean"].reshape(1, -1, 1, 1)
    std = params["std"].reshape(1, -1, 1, 1)
    xn = (x_nchw - mean) / std
    y = jax.lax.conv_general_dilated(
        xn, params["conv_w"], (1, 1), "SAME",
        dimension_numbers=("NCHW", "OIHW", "NCHW"),
    )
    y = jnp.maximum(y + params["conv_b"].reshape(1, -1, 1, 1), 0.0)
    pooled = jnp.mean(y, axis=(2, 3))
    return pooled @ params["fc_w"].T + params["fc_b"]


# ------------------------------------------------------------------ main -----
if __name__ == "__main__":
    key = jax.random.PRNGKey(0)
    kx, kp = jax.random.split(key)

    B, C, H, W = 2, 4, 16, 16                      # PyTorch NCHW input
    x = jax.random.uniform(kx, (B, C, H, W), jnp.float32)
    params = init_params(kp, C=C)
    prepared = prepare_params(params)              # one-time weight folding

    fwd = jax.jit(model_wrapper_forward)
    logits = jax.block_until_ready(fwd(prepared, x))

    ref = jax.block_until_ready(reference_forward(params, x))
    np.testing.assert_allclose(np.asarray(logits), np.asarray(ref),
                               rtol=1e-5, atol=1e-5)

    print("KERNEL_OK")
</pallas_src>

<mosaic_0001>
module attributes {stable_mosaic.version = 11 : i64} {
  func.func @_fused_forward_kernel(%arg0: i32, %arg1: memref<1x18x18x4xf32, #tpu.memory_space<vmem>>, %arg2: memref<9x4x8xf32, #tpu.memory_space<vmem>>, %arg3: memref<1x8xf32, #tpu.memory_space<vmem>>, %arg4: memref<8x10xf32, #tpu.memory_space<vmem>>, %arg5: memref<1x10xf32, #tpu.memory_space<vmem>>, %arg6: memref<1x1x10xf32, #tpu.memory_space<vmem>>) attributes {dimension_semantics = [#tpu.dimension_semantics<parallel>], iteration_bounds = array<i64: 2>, scalar_prefetch = 0 : i64, scratch_operands = 0 : i64, tpu.core_type = #tpu.core_type<tc>, window_params = [{transform_indices = @transform_0, window_bounds = array<i64: 1, 18, 18, 4>}, {pipeline_mode = #tpu.pipeline_mode<synchronous>, transform_indices = @transform_1, window_bounds = array<i64: 9, 4, 8>}, {pipeline_mode = #tpu.pipeline_mode<synchronous>, transform_indices = @transform_2, window_bounds = array<i64: 1, 8>}, {pipeline_mode = #tpu.pipeline_mode<synchronous>, transform_indices = @transform_3, window_bounds = array<i64: 8, 10>}, {pipeline_mode = #tpu.pipeline_mode<synchronous>, transform_indices = @transform_4, window_bounds = array<i64: 1, 10>}, {transform_indices = @transform_5, window_bounds = array<i64: 1, 1, 10>}]} {
    %cst = arith.constant 0.000000e+00 : f32
    %0 = vector.broadcast %cst : f32 to vector<256x8xf32>
    %c0 = arith.constant 0 : index
    %c0_0 = arith.constant 0 : index
    %c0_1 = arith.constant 0 : index
    %c0_2 = arith.constant 0 : index
    %1 = vector.load %arg1[%c0, %c0_0, %c0_1, %c0_2] : memref<1x18x18x4xf32, #tpu.memory_space<vmem>>, vector<1x16x16x4xf32>
    %2 = vector.shape_cast %1 : vector<1x16x16x4xf32> to vector<16x16x4xf32>
    %3 = vector.shape_cast %2 : vector<16x16x4xf32> to vector<256x4xf32>
    %c0_3 = arith.constant 0 : index
    %c0_4 = arith.constant 0 : index
    %c0_5 = arith.constant 0 : index
    %4 = vector.load %arg2[%c0_3, %c0_4, %c0_5] : memref<9x4x8xf32, #tpu.memory_space<vmem>>, vector<1x4x8xf32>
    %5 = vector.shape_cast %4 : vector<1x4x8xf32> to vector<4x8xf32>
    %cst_6 = arith.constant dense<0.000000e+00> : vector<256x8xf32>
    %6 = tpu.matmul %3, %5, %cst_6 {dimension_numbers = #tpu.dot_dimension_numbers<[1], [0], [0], [1], [0, 0, 1, 1], [], []>} : vector<256x4xf32>, vector<4x8xf32>, vector<256x8xf32> -> vector<256x8xf32>
    %7 = arith.addf %0, %6 : vector<256x8xf32>
    %c0_7 = arith.constant 0 : index
    %c0_8 = arith.constant 0 : index
    %c1 = arith.constant 1 : index
    %c0_9 = arith.constant 0 : index
    %8 = vector.load %arg1[%c0_7, %c0_8, %c1, %c0_9] : memref<1x18x18x4xf32, #tpu.memory_space<vmem>>, vector<1x16x16x4xf32>
    %9 = vector.shape_cast %8 : vector<1x16x16x4xf32> to vector<16x16x4xf32>
    %10 = vector.shape_cast %9 : vector<16x16x4xf32> to vector<256x4xf32>
    %c1_10 = arith.constant 1 : index
    %c0_11 = arith.constant 0 : index
    %c0_12 = arith.constant 0 : index
    %11 = vector.load %arg2[%c1_10, %c0_11, %c0_12] : memref<9x4x8xf32, #tpu.memory_space<vmem>>, vector<1x4x8xf32>
    %12 = vector.shape_cast %11 : vector<1x4x8xf32> to vector<4x8xf32>
    %cst_13 = arith.constant dense<0.000000e+00> : vector<256x8xf32>
    %13 = tpu.matmul %10, %12, %cst_13 {dimension_numbers = #tpu.dot_dimension_numbers<[1], [0], [0], [1], [0, 0, 1, 1], [], []>} : vector<256x4xf32>, vector<4x8xf32>, vector<256x8xf32> -> vector<256x8xf32>
    %14 = arith.addf %7, %13 : vector<256x8xf32>
    %c0_14 = arith.constant 0 : index
    %c0_15 = arith.constant 0 : index
    %c2 = arith.constant 2 : index
    %c0_16 = arith.constant 0 : index
    %15 = vector.load %arg1[%c0_14, %c0_15, %c2, %c0_16] : memref<1x18x18x4xf32, #tpu.memory_space<vmem>>, vector<1x16x16x4xf32>
    %16 = vector.shape_cast %15 : vector<1x16x16x4xf32> to vector<16x16x4xf32>
    %17 = vector.shape_cast %16 : vector<16x16x4xf32> to vector<256x4xf32>
    %c2_17 = arith.constant 2 : index
    %c0_18 = arith.constant 0 : index
    %c0_19 = arith.constant 0 : index
    %18 = vector.load %arg2[%c2_17, %c0_18, %c0_19] : memref<9x4x8xf32, #tpu.memory_space<vmem>>, vector<1x4x8xf32>
    %19 = vector.shape_cast %18 : vector<1x4x8xf32> to vector<4x8xf32>
    %cst_20 = arith.constant dense<0.000000e+00> : vector<256x8xf32>
    %20 = tpu.matmul %17, %19, %cst_20 {dimension_numbers = #tpu.dot_dimension_numbers<[1], [0], [0], [1], [0, 0, 1, 1], [], []>} : vector<256x4xf32>, vector<4x8xf32>, vector<256x8xf32> -> vector<256x8xf32>
    %21 = arith.addf %14, %20 : vector<256x8xf32>
    %c0_21 = arith.constant 0 : index
    %c1_22 = arith.constant 1 : index
    %c0_23 = arith.constant 0 : index
    %c0_24 = arith.constant 0 : index
    %22 = vector.load %arg1[%c0_21, %c1_22, %c0_23, %c0_24] : memref<1x18x18x4xf32, #tpu.memory_space<vmem>>, vector<1x16x16x4xf32>
    %23 = vector.shape_cast %22 : vector<1x16x16x4xf32> to vector<16x16x4xf32>
    %24 = vector.shape_cast %23 : vector<16x16x4xf32> to vector<256x4xf32>
    %c3 = arith.constant 3 : index
    %c0_25 = arith.constant 0 : index
    %c0_26 = arith.constant 0 : index
    %25 = vector.load %arg2[%c3, %c0_25, %c0_26] : memref<9x4x8xf32, #tpu.memory_space<vmem>>, vector<1x4x8xf32>
    %26 = vector.shape_cast %25 : vector<1x4x8xf32> to vector<4x8xf32>
    %cst_27 = arith.constant dense<0.000000e+00> : vector<256x8xf32>
    %27 = tpu.matmul %24, %26, %cst_27 {dimension_numbers = #tpu.dot_dimension_numbers<[1], [0], [0], [1], [0, 0, 1, 1], [], []>} : vector<256x4xf32>, vector<4x8xf32>, vector<256x8xf32> -> vector<256x8xf32>
    %28 = arith.addf %21, %27 : vector<256x8xf32>
    %c0_28 = arith.constant 0 : index
    %c1_29 = arith.constant 1 : index
    %c1_30 = arith.constant 1 : index
    %c0_31 = arith.constant 0 : index
    %29 = vector.load %arg1[%c0_28, %c1_29, %c1_30, %c0_31] : memref<1x18x18x4xf32, #tpu.memory_space<vmem>>, vector<1x16x16x4xf32>
    %30 = vector.shape_cast %29 : vector<1x16x16x4xf32> to vector<16x16x4xf32>
    %31 = vector.shape_cast %30 : vector<16x16x4xf32> to vector<256x4xf32>
    %c4 = arith.constant 4 : index
    %c0_32 = arith.constant 0 : index
    %c0_33 = arith.constant 0 : index
    %32 = vector.load %arg2[%c4, %c0_32, %c0_33] : memref<9x4x8xf32, #tpu.memory_space<vmem>>, vector<1x4x8xf32>
    %33 = vector.shape_cast %32 : vector<1x4x8xf32> to vector<4x8xf32>
    %cst_34 = arith.constant dense<0.000000e+00> : vector<256x8xf32>
    %34 = tpu.matmul %31, %33, %cst_34 {dimension_numbers = #tpu.dot_dimension_numbers<[1], [0], [0], [1], [0, 0, 1, 1], [], []>} : vector<256x4xf32>, vector<4x8xf32>, vector<256x8xf32> -> vector<256x8xf32>
    %35 = arith.addf %28, %34 : vector<256x8xf32>
    %c0_35 = arith.constant 0 : index
    %c1_36 = arith.constant 1 : index
    %c2_37 = arith.constant 2 : index
    %c0_38 = arith.constant 0 : index
    %36 = vector.load %arg1[%c0_35, %c1_36, %c2_37, %c0_38] : memref<1x18x18x4xf32, #tpu.memory_space<vmem>>, vector<1x16x16x4xf32>
    %37 = vector.shape_cast %36 : vector<1x16x16x4xf32> to vector<16x16x4xf32>
    %38 = vector.shape_cast %37 : vector<16x16x4xf32> to vector<256x4xf32>
    %c5 = arith.constant 5 : index
    %c0_39 = arith.constant 0 : index
    %c0_40 = arith.constant 0 : index
    %39 = vector.load %arg2[%c5, %c0_39, %c0_40] : memref<9x4x8xf32, #tpu.memory_space<vmem>>, vector<1x4x8xf32>
    %40 = vector.shape_cast %39 : vector<1x4x8xf32> to vector<4x8xf32>
    %cst_41 = arith.constant dense<0.000000e+00> : vector<256x8xf32>
    %41 = tpu.matmul %38, %40, %cst_41 {dimension_numbers = #tpu.dot_dimension_numbers<[1], [0], [0], [1], [0, 0, 1, 1], [], []>} : vector<256x4xf32>, vector<4x8xf32>, vector<256x8xf32> -> vector<256x8xf32>
    %42 = arith.addf %35, %41 : vector<256x8xf32>
    %c0_42 = arith.constant 0 : index
    %c2_43 = arith.constant 2 : index
    %c0_44 = arith.constant 0 : index
    %c0_45 = arith.constant 0 : index
    %43 = vector.load %arg1[%c0_42, %c2_43, %c0_44, %c0_45] : memref<1x18x18x4xf32, #tpu.memory_space<vmem>>, vector<1x16x16x4xf32>
    %44 = vector.shape_cast %43 : vector<1x16x16x4xf32> to vector<16x16x4xf32>
    %45 = vector.shape_cast %44 : vector<16x16x4xf32> to vector<256x4xf32>
    %c6 = arith.constant 6 : index
    %c0_46 = arith.constant 0 : index
    %c0_47 = arith.constant 0 : index
    %46 = vector.load %arg2[%c6, %c0_46, %c0_47] : memref<9x4x8xf32, #tpu.memory_space<vmem>>, vector<1x4x8xf32>
    %47 = vector.shape_cast %46 : vector<1x4x8xf32> to vector<4x8xf32>
    %cst_48 = arith.constant dense<0.000000e+00> : vector<256x8xf32>
    %48 = tpu.matmul %45, %47, %cst_48 {dimension_numbers = #tpu.dot_dimension_numbers<[1], [0], [0], [1], [0, 0, 1, 1], [], []>} : vector<256x4xf32>, vector<4x8xf32>, vector<256x8xf32> -> vector<256x8xf32>
    %49 = arith.addf %42, %48 : vector<256x8xf32>
    %c0_49 = arith.constant 0 : index
    %c2_50 = arith.constant 2 : index
    %c1_51 = arith.constant 1 : index
    %c0_52 = arith.constant 0 : index
    %50 = vector.load %arg1[%c0_49, %c2_50, %c1_51, %c0_52] : memref<1x18x18x4xf32, #tpu.memory_space<vmem>>, vector<1x16x16x4xf32>
    %51 = vector.shape_cast %50 : vector<1x16x16x4xf32> to vector<16x16x4xf32>
    %52 = vector.shape_cast %51 : vector<16x16x4xf32> to vector<256x4xf32>
    %c7 = arith.constant 7 : index
    %c0_53 = arith.constant 0 : index
    %c0_54 = arith.constant 0 : index
    %53 = vector.load %arg2[%c7, %c0_53, %c0_54] : memref<9x4x8xf32, #tpu.memory_space<vmem>>, vector<1x4x8xf32>
    %54 = vector.shape_cast %53 : vector<1x4x8xf32> to vector<4x8xf32>
    %cst_55 = arith.constant dense<0.000000e+00> : vector<256x8xf32>
    %55 = tpu.matmul %52, %54, %cst_55 {dimension_numbers = #tpu.dot_dimension_numbers<[1], [0], [0], [1], [0, 0, 1, 1], [], []>} : vector<256x4xf32>, vector<4x8xf32>, vector<256x8xf32> -> vector<256x8xf32>
    %56 = arith.addf %49, %55 : vector<256x8xf32>
    %c0_56 = arith.constant 0 : index
    %c2_57 = arith.constant 2 : index
    %c2_58 = arith.constant 2 : index
    %c0_59 = arith.constant 0 : index
    %57 = vector.load %arg1[%c0_56, %c2_57, %c2_58, %c0_59] : memref<1x18x18x4xf32, #tpu.memory_space<vmem>>, vector<1x16x16x4xf32>
    %58 = vector.shape_cast %57 : vector<1x16x16x4xf32> to vector<16x16x4xf32>
    %59 = vector.shape_cast %58 : vector<16x16x4xf32> to vector<256x4xf32>
    %c8 = arith.constant 8 : index
    %c0_60 = arith.constant 0 : index
    %c0_61 = arith.constant 0 : index
    %60 = vector.load %arg2[%c8, %c0_60, %c0_61] : memref<9x4x8xf32, #tpu.memory_space<vmem>>, vector<1x4x8xf32>
    %61 = vector.shape_cast %60 : vector<1x4x8xf32> to vector<4x8xf32>
    %cst_62 = arith.constant dense<0.000000e+00> : vector<256x8xf32>
    %62 = tpu.matmul %59, %61, %cst_62 {dimension_numbers = #tpu.dot_dimension_numbers<[1], [0], [0], [1], [0, 0, 1, 1], [], []>} : vector<256x4xf32>, vector<4x8xf32>, vector<256x8xf32> -> vector<256x8xf32>
    %63 = arith.addf %56, %62 : vector<256x8xf32>
    %c0_63 = arith.constant 0 : index
    %c0_64 = arith.constant 0 : index
    %64 = vector.load %arg3[%c0_63, %c0_64] : memref<1x8xf32, #tpu.memory_space<vmem>>, vector<1x8xf32>
    %65 = vector.broadcast %64 : vector<1x8xf32> to vector<256x8xf32>
    %66 = arith.addf %63, %65 : vector<256x8xf32>
    %cst_65 = arith.constant 0.000000e+00 : f32
    %67 = vector.broadcast %cst_65 : f32 to vector<256x8xf32>
    %68 = arith.maximumf %66, %67 : vector<256x8xf32>
    %cst_66 = arith.constant dense<0.000000e+00> : vector<8xf32>
    %69 = vector.multi_reduction <add>, %68, %cst_66 [0] : vector<256x8xf32> to vector<8xf32>
    %70 = vector.shape_cast %69 : vector<8xf32> to vector<1x8xf32>
    %cst_67 = arith.constant 2.560000e+02 : f32
    %71 = vector.broadcast %cst_67 : f32 to vector<1x8xf32>
    %72 = arith.divf %70, %71 : vector<1x8xf32>
    %c0_68 = arith.constant 0 : index
    %c0_69 = arith.constant 0 : index
    %73 = vector.load %arg4[%c0_68, %c0_69] : memref<8x10xf32, #tpu.memory_space<vmem>>, vector<8x10xf32>
    %cst_70 = arith.constant dense<0.000000e+00> : vector<1x10xf32>
    %74 = tpu.matmul %72, %73, %cst_70 {dimension_numbers = #tpu.dot_dimension_numbers<[1], [0], [0], [1], [0, 0, 1, 1], [], []>} : vector<1x8xf32>, vector<8x10xf32>, vector<1x10xf32> -> vector<1x10xf32>
    %c0_71 = arith.constant 0 : index
    %c0_72 = arith.constant 0 : index
    %75 = vector.load %arg5[%c0_71, %c0_72] : memref<1x10xf32, #tpu.memory_space<vmem>>, vector<1x10xf32>
    %76 = arith.addf %74, %75 : vector<1x10xf32>
    %c0_73 = arith.constant 0 : index
    %c0_74 = arith.constant 0 : index
    %c0_75 = arith.constant 0 : index
    %77 = vector.load %arg6[%c0_73, %c0_74, %c0_75] : memref<1x1x10xf32, #tpu.memory_space<vmem>>, vector<1x1x10xf32>
    %78 = vector.shape_cast %77 : vector<1x1x10xf32> to vector<1x10xf32>
    %79 = vector.shape_cast %76 : vector<1x10xf32> to vector<1x1x10xf32>
    tpu.vector_store %arg6[%c0_73, %c0_74, %c0_75], %79 {strides = array<i32>} : memref<1x1x10xf32, #tpu.memory_space<vmem>>, vector<1x1x10xf32>,
    return
  }
  func.func @transform_0(%arg0: i32) -> (i32, i32, i32, i32) {
    %c0_i32 = arith.constant 0 : i32
    %c0_i32_0 = arith.constant 0 : i32
    %c0_i32_1 = arith.constant 0 : i32
    %c0_i32_2 = arith.constant 0 : i32
    return %arg0, %c0_i32, %c0_i32_0, %c0_i32_1 : i32, i32, i32, i32
  }
  func.func @transform_1(%arg0: i32) -> (i32, i32, i32) {
    %c0_i32 = arith.constant 0 : i32
    %c0_i32_0 = arith.constant 0 : i32
    %c0_i32_1 = arith.constant 0 : i32
    %c0_i32_2 = arith.constant 0 : i32
    return %c0_i32, %c0_i32_0, %c0_i32_1 : i32, i32, i32
  }
  func.func @transform_2(%arg0: i32) -> (i32, i32) {
    %c0_i32 = arith.constant 0 : i32
    %c0_i32_0 = arith.constant 0 : i32
    %c0_i32_1 = arith.constant 0 : i32
    return %c0_i32, %c0_i32_0 : i32, i32
  }
  func.func @transform_3(%arg0: i32) -> (i32, i32) {
    %c0_i32 = arith.constant 0 : i32
    %c0_i32_0 = arith.constant 0 : i32
    %c0_i32_1 = arith.constant 0 : i32
    return %c0_i32, %c0_i32_0 : i32, i32
  }
  func.func @transform_4(%arg0: i32) -> (i32, i32) {
    %c0_i32 = arith.constant 0 : i32
    %c0_i32_0 = arith.constant 0 : i32
    %c0_i32_1 = arith.constant 0 : i32
    return %c0_i32, %c0_i32_0 : i32, i32
  }
  func.func @transform_5(%arg0: i32) -> (i32, i32, i32) {
    %c0_i32 = arith.constant 0 : i32
    %c0_i32_0 = arith.constant 0 : i32
    %c0_i32_1 = arith.constant 0 : i32
    return %arg0, %c0_i32, %c0_i32_0 : i32, i32, i32
  }
}

</mosaic_0001>

<bundles_post_ra>
// kernel: model_wrapper_forward.1
= control target key start
LH: loop header
LB: loop body
LE: loop exit
PB: predicated region body
PF: predicated region fallthrough
CT: control target
= control target key end

     0   :  { %10 = vsyncpa [#allocation3], 0  ;;  %s6899_s0 = inlined_call_operand.vmem [shape: f32[2,18,18,4], index: 0, kind: input, shape index: {}]   ;;  %s6900_s1 = inlined_call_operand.vmem [shape: f32[9,4,8], index: 1, kind: input, shape index: {}]   ;;  %s6901_s2 = inlined_call_operand.vmem [shape: f32[1,8], index: 2, kind: input, shape index: {}]   ;;  %s6902_s3 = inlined_call_operand.vmem [shape: f32[8,10], index: 3, kind: input, shape index: {}]   ;;  %s6903_s4 = inlined_call_operand.vmem [shape: f32[1,10], index: 4, kind: input, shape index: {}]   ;;  %s6904_s5 = inlined_call_operand.hbm [shape: f32[2,1,10], index: 5, kind: output, shape index: {}]  }
   0x1   :  { %12 = vsyncpa [#allocation3 + $0x1], 0  ;;  %s5359_s18 = smov 0   ;;  %s5361_s19 = smov 0  }
   0x2   :  { %s5363_s20 = smov 0   ;;  %s5365_s21 = smov 0  }
   0x3 LB: > { %s5380_s22 = sadd.s32 4294967295, %s5324_s21   ;;  %s3959_s23 = sadd.s32 4294967294, %s5324_s21   ;;  %s5324_s21 = sphi %s5365_s21, %s7081_s21   ;;  %s5320_s20 = sphi %s5363_s20, %s7080_s20   ;;  %s5316_s19 = sphi %s5361_s19, %s7079_s19   ;;  %s5312_s18 = sphi %s5359_s18, %s7078_s18  }
   0x4   : > { %s5384_s24 = sadd.s32 1, %s5324_s21   ;;  %s135_s25 = sadd.s32 1, %s5320_s20 }
   0x5   : > { %s132_s26 = ssub.s32 %s5324_s21, %s5384_s24  ;;  %p145_p0 = scmp.ne.s32.totalorder %s5320_s20, %s5316_s19 }
   0x6   : > { %p133_p1 = scmp.eq.s32.totalorder %s132_s26, 0  ;;  %p146_p2 = scmp.eq.s32.totalorder %s5380_s22, 1 }
   0x7   : > { %p151_p3 = scmp.ne.s32.totalorder %s5316_s19, %s5312_s18  ;;  %p152_p4 = scmp.eq.s32.totalorder %s3959_s23, 1 }
   0x8   : > { %s5395_s27 = scalar_select %p133_p1, %s5320_s20, %s135_s25  }
   0x9   : > { %p5397_p5 = por %p146_p2, %p145_p0  ;;  %p5401_p6 = por %p152_p4, %p151_p3 }
   0xa   : > { %p3962_p7 = scmp.ge.s32.totalorder %s5324_s21, 1  ;;  %p190_p8 = scmp.lt.s32.totalorder %s5324_s21, 3 }
   0xc   : > { %p191_p9 = pnand %p3962_p7, %p190_p8 }
   0xe   : > { %194 = sbr.rel (%p191_p9) target bundleno = 744 (0x2e8), region = 40 }
  0x13   : > { %v3964_v0 = vld [vmem:[%s6900_s1 + $0x4] sm:$0xf]  ;;  %vm386_vm0 = vcmask 1043456   ;;  %p217_p10 = scmp.lt.s32.totalorder %s5380_s22, 1  ;;  %v4031_v1 = vld [vmem:[%s6900_s1 + $0x8] sm:$0xf] }
  0x14   : > { %4765 = vmatprep.subr.msk.mxu0 %vm386_vm0, %v3964_v0  ;;  %5220 = vmatprep.subr.msk.mxu1 %vm386_vm0, %v3964_v0  ;;  %v254_v2 = vld [vmem:[%s6900_s1] sm:$0xf]  ;;  %vm289_vm1 = vcmask 31744   ;;  %v5452_v9 = vld [vmem:[%s6900_s1 + $0xc] sm:$0xf]  ;;  %vm5327_vm2 = vmmov 0  }
  0x15   : > { %4766 = vmatpush3.msk.msra.mxu0 %vm386_vm0, %v3964_v0  ;;  %5221 = vmatpush3.msk.msra.mxu1 %vm386_vm0, %v3964_v0  ;;  %s218_s11 = scalar_select %p217_p10, %s5380_s22, 1  ;;  %v5457_v10 = vld [vmem:[%s6900_s1 + $0x10] sm:$0xf]  ;;  %v5602_v39 = vld [vmem:[%s6900_s1 + $0x14] sm:$0xf]  ;;  %vm3742_vm3 = vcmask 64512  }
  0x16   : > { %4865 = vmatprep.subr.msk.mxu0 %vm386_vm0, %v4031_v1  ;;  %4815 = vmatprep.subr.msk.mxu1 %vm386_vm0, %v254_v2  ;;  %v5642_v48 = vld [vmem:[%s6900_s1 + $0x18] sm:$0xf]  ;;  %s215_s16 = sand.u32 1, %s5316_s19   ;;  %s4463_s25 = sshll.u32 %s5380_s22, 4  ;;  %vm3889_vm4 = vcmask 73728  }
  0x17   : > { %s5222_s12 = smul.u32 432, %s218_s11  ;;  %s216_s26 = scalar_lea.vmem [#allocation2], %s215_s16 }
  0x18   : > { %s3904_s30 = sshll.u32 %s216_s26, 4  ;;  %s6864_s8 = scalar_lea.hbm %s6904_s5, %s4463_s25  ;;  %s3905_s30 = int_to_ptr.vmem [resolvable:$true] %s3904_s30 }
  0x19   : > { %s5427_s15 = scalar_lea.vmem %s6899_s0, %s5222_s12  ;;  %s3892_s9 = scalar_lea.sflag [#allocation3], %s215_s16 }
  0x1a   : > { %v255_v3 = vld [vmem:[%s5427_s15 + $0x1] sm:$0xff]  ;;  %v5431_v4 = vld [vmem:[%s5427_s15 + $0xd9] sm:$0xff]  ;;  %v256_v5 = vld [vmem:[%s5427_s15 + $0x9] sm:$0xff]  ;;  %s5264_s10 = scalar_lea.vmem %s3905_s30, 16  ;;  %s5328_s22 = smov [#allocation2]  }
  0x1b   : > { %4767 = vmatprep.mubr.msk.f32.mxu0 %vm289_vm1, %v255_v3  ;;  %4794 = vmatprep.mubr.msk.f32.mxu1 %vm289_vm1, %v5431_v4  ;;  %v5438_v6 = vld [vmem:[%s5427_s15 + $0xe1] sm:$0xff]  ;;  %v5441_v7 = vld [vmem:[%s5427_s15 + $0x19] sm:$0xff]  ;;  %v5444_v8 = vld [vmem:[%s5427_s15 + $0xf1] sm:$0xff]  ;;  %p5265_p11 = scmp.ne.s32.totalorder %s3905_s30, %s5264_s10  ;;  %s5268_s11 = sshll.u32 %s5328_s22, 4  ;;  %s5269_s11 = int_to_ptr.vmem [resolvable:$false] %s5268_s11 }
  0x1c   : > { %4768 = vmatmul.mubr.msk.f32.vlgmr.msra.gmra.mxu0 %vm289_vm1, %v256_v5  ;;  %4795 = vmatmul.mubr.msk.f32.vlgmr.msra.gmra.mxu1 %vm289_vm1, %v5438_v6  ;;  %v5463_v11 = vld [vmem:[%s5427_s15 + $0x21] sm:$0xff]  ;;  %v5466_v12 = vld [vmem:[%s5427_s15 + $0xf9] sm:$0xff]  ;;  %v5472_v13 = vld [vmem:[%s5427_s15 + $0x31] sm:$0xff]  ;;  %s5270_s12 = scalar_lea.vmem %s5269_s11, 32  ;;  %p5271_p0 = scmp.lt.s32.totalorder %s3905_s30, %s5269_s11 }
  0x1d   : > { %4866 = vmatpush3.msk.msra.mxu0 %vm386_vm0, %v4031_v1  ;;  %4770 = vmatprep.mubr.msk.f32.mxu0 %vm289_vm1, %v5441_v7  ;;  %v5475_v14 = vld [vmem:[%s5427_s15 + $0x109] sm:$0xff]  ;;  %v5490_v15 = vld [vmem:[%s5427_s15 + $0x39] sm:$0xff]  ;;  %v5493_v16 = vld [vmem:[%s5427_s15 + $0x111] sm:$0xff]  ;;  %p5266_p12 = pnand %p5265_p11, %p5397_p5  ;;  %p5272_p1 = scmp.lt.s32.totalorder %s5270_s12, %s5264_s10 }
  0x1e   : > { %4797 = vmatprep.mubr.msk.f32.mxu1 %vm289_vm1, %v5444_v8  ;;  %4816 = vmatpush3.msk.msra.mxu1 %vm386_vm0, %v254_v2  ;;  %v5496_v17 = vld [vmem:[%s5427_s15 + $0x49] sm:$0xff]  ;;  %v5499_v18 = vld [vmem:[%s5427_s15 + $0x121] sm:$0xff]  ;;  %v5510_v19 = vld [vmem:[%s5427_s15 + $0x51] sm:$0xff] }
  0x1f   : > { %4915 = vmatprep.subr.msk.mxu1 %vm386_vm0, %v5452_v9  ;;  %4965 = vmatprep.subr.msk.mxu0 %vm386_vm0, %v5457_v10  ;;  %v5513_v20 = vld [vmem:[%s5427_s15 + $0x129] sm:$0xff]  ;;  %v5516_v21 = vld [vmem:[%s5427_s15 + $0x61] sm:$0xff]  ;;  %v5519_v22 = vld [vmem:[%s5427_s15 + $0x139] sm:$0xff]  ;;  %p5267_p13 = pneg %p5266_p12  ;;  %p5273_p2 = por %p5272_p1, %p5271_p0 }
  0x20   : > { %4771 = vmatmul.mubr.msk.f32.gmra.mxu0 %vm289_vm1, %v5463_v11  ;;  %4798 = vmatmul.mubr.msk.f32.gmra.mxu1 %vm289_vm1, %v5466_v12  ;;  %v5530_v23 = vld [vmem:[%s5427_s15 + $0x69] sm:$0xff]  ;;  %v5533_v24 = vld [vmem:[%s5427_s15 + $0x141] sm:$0xff]  ;;  %v5536_v25 = vld [vmem:[%s5427_s15 + $0x79] sm:$0xff] }
  0x21   : > { %4773 = vmatprep.mubr.msk.f32.mxu0 %vm289_vm1, %v5472_v13  ;;  %4800 = vmatprep.mubr.msk.f32.mxu1 %vm289_vm1, %v5475_v14  ;;  %v5539_v26 = vld [vmem:[%s5427_s15 + $0x151] sm:$0xff]  ;;  %v5550_v27 = vld [vmem:[%s5427_s15 + $0x81] sm:$0xff]  ;;  %v5553_v28 = vld [vmem:[%s5427_s15 + $0x159] sm:$0xff]  ;;  %p5274_p3 = pnand %p5273_p2, %p5267_p13 }
  0x22   : > { %v5556_v29 = vld [vmem:[%s5427_s15 + $0x91] sm:$0xff]  ;;  %v5559_v30 = vld [vmem:[%s5427_s15 + $0x169] sm:$0xff]  ;;  %v5570_v31 = vld [vmem:[%s5427_s15 + $0x99] sm:$0xff] }
  0x23   : > { %6963 = vst [vmem:[#allocation5_spill] sm:$0xff] %v5559_v30  ;;  %v5573_v32 = vld [vmem:[%s5427_s15 + $0x171] sm:$0xff]  ;;  %v5576_v33 = vld [vmem:[%s5427_s15 + $0xa9] sm:$0xff]  ;;  %v222_v34 = vld [vmem:[%s5427_s15] sm:$0xff] }
  0x24   : > { %4774 = vmatmul.mubr.msk.f32.gmra.mxu0 %vm289_vm1, %v5490_v15  ;;  %4801 = vmatmul.mubr.msk.f32.gmra.mxu1 %vm289_vm1, %v5493_v16  ;;  %6964 = vst [vmem:[#allocation6_spill] sm:$0xff] %v5573_v32  ;;  %v5587_v35 = vld [vmem:[%s5427_s15 + $0xb1] sm:$0xff]  ;;  %v223_v36 = vld [vmem:[%s5427_s15 + $0x8] sm:$0xff]  ;;  %v5612_v41 = vld [vmem:[%s5427_s15 + $0x20] sm:$0xff] }
  0x25   : > { %4776 = vmatprep.mubr.msk.f32.mxu0 %vm289_vm1, %v5496_v17  ;;  %4803 = vmatprep.mubr.msk.f32.mxu1 %vm289_vm1, %v5499_v18  ;;  %v5591_v37 = vld [vmem:[%s5427_s15 + $0xc1] sm:$0xff]  ;;  %v5594_v38 = vld [vmem:[%s5427_s15 + $0x18] sm:$0xff]  ;;  %v5609_v40 = vld [vmem:[%s5427_s15 + $0xc9] sm:$0xff] }
  0x26   : > { %v5617_v42 = vld [vmem:[%s5427_s15 + $0x30] sm:$0xff]  ;;  %v939_v43 = vld [vmem:[%s5427_s15 + $0x2] sm:$0xff]  ;;  %v5630_v44 = vld [vmem:[%s5427_s15 + $0x38] sm:$0xff] }
  0x27   : > { %v940_v45 = vld [vmem:[%s5427_s15 + $0xa] sm:$0xff]  ;;  %v5637_v47 = vld [vmem:[%s5427_s15 + $0x1a] sm:$0xff]  ;;  %v5655_v50 = vld [vmem:[%s5427_s15 + $0x22] sm:$0xff] }
  0x28   : > { %4777 = vmatmul.mubr.msk.f32.gmra.mxu0 %vm289_vm1, %v5510_v19  ;;  %4804 = vmatmul.mubr.msk.f32.gmra.mxu1 %vm289_vm1, %v5513_v20  ;;  %v5634_v46 = vld [vmem:[%s5427_s15 + $0x48] sm:$0xff]  ;;  %6965 = vst [vmem:[#allocation7_spill] sm:$0xff] %v5637_v47  ;;  %v5652_v49 = vld [vmem:[%s5427_s15 + $0x50] sm:$0xff]  ;;  %6966 = vst [vmem:[#allocation8_spill] sm:$0xff] %v5655_v50 }
  0x29   : > { %4779 = vmatprep.mubr.msk.f32.mxu0 %vm289_vm1, %v5516_v21  ;;  %4806 = vmatprep.mubr.msk.f32.mxu1 %vm289_vm1, %v5519_v22  ;;  %v5660_v51 = vld [vmem:[%s5427_s15 + $0x60] sm:$0xff]  ;;  %v5663_v52 = vld [vmem:[%s5427_s15 + $0x32] sm:$0xff]  ;;  %v5676_v53 = vld [vmem:[%s5427_s15 + $0x68] sm:$0xff] }
  0x2a   : > { %6967 = vst [vmem:[#allocation9_spill] sm:$0xff] %v5663_v52  ;;  %v5679_v54 = vld [vmem:[%s5427_s15 + $0x3a] sm:$0xff]  ;;  %v5685_v56 = vld [vmem:[%s5427_s15 + $0x4a] sm:$0xff]  ;;  %v5699_v58 = vld [vmem:[%s5427_s15 + $0x52] sm:$0xff] }
  0x2b   : > { %6968 = vst [vmem:[#allocation10_spill] sm:$0xff] %v5679_v54  ;;  %v5682_v55 = vld [vmem:[%s5427_s15 + $0x78] sm:$0xff]  ;;  %6969 = vst [vmem:[#allocation11_spill] sm:$0xff] %v5685_v56  ;;  %v5696_v57 = vld [vmem:[%s5427_s15 + $0x80] sm:$0xff] }
  0x2c   : > { %4780 = vmatmul.mubr.msk.f32.gmra.mxu0 %vm289_vm1, %v5530_v23  ;;  %4807 = vmatmul.mubr.msk.f32.gmra.mxu1 %vm289_vm1, %v5533_v24  ;;  %6970 = vst [vmem:[#allocation12_spill] sm:$0xff] %v5699_v58  ;;  %v5702_v59 = vld [vmem:[%s5427_s15 + $0x90] sm:$0xff]  ;;  %v5705_v60 = vld [vmem:[%s5427_s15 + $0x62] sm:$0xff]  ;;  %v5716_v61 = vld [vmem:[%s5427_s15 + $0x98] sm:$0xff] }
  0x2d   : > { %4782 = vmatprep.mubr.msk.f32.mxu0 %vm289_vm1, %v5536_v25  ;;  %4809 = vmatprep.mubr.msk.f32.mxu1 %vm289_vm1, %v5539_v26  ;;  %6971 = vst [vmem:[#allocation13_spill] sm:$0xff] %v5705_v60  ;;  %v5719_v62 = vld [vmem:[%s5427_s15 + $0x6a] sm:$0xff]  ;;  %v5725_v0 = vld [vmem:[%s5427_s15 + $0x7a] sm:$0xff]  ;;  %v5739_v2 = vld [vmem:[%s5427_s15 + $0x82] sm:$0xff] }
  0x2e   : > { %6972 = vst [vmem:[#allocation14_spill] sm:$0xff] %v5719_v62  ;;  %v5722_v63 = vld [vmem:[%s5427_s15 + $0xa8] sm:$0xff]  ;;  %6973 = vst [vmem:[#allocation15_spill] sm:$0xff] %v5725_v0  ;;  %v5736_v1 = vld [vmem:[%s5427_s15 + $0xb0] sm:$0xff] }
  0x2f   : > { %6974 = vst [vmem:[#allocation16_spill] sm:$0xff] %v5739_v2  ;;  %v5742_v3 = vld [vmem:[%s5427_s15 + $0xc0] sm:$0xff]  ;;  %v5745_v5 = vld [vmem:[%s5427_s15 + $0x92] sm:$0xff] }
  0x30   : > { %4783 = vmatmul.mubr.msk.f32.gmra.mxu0 %vm289_vm1, %v5550_v27  ;;  %4810 = vmatmul.mubr.msk.f32.gmra.mxu1 %vm289_vm1, %v5553_v28  ;;  %6975 = vst [vmem:[#allocation17_spill] sm:$0xff] %v5745_v5 }
  0x31   : > { %4785 = vmatprep.mubr.msk.f32.mxu0 %vm289_vm1, %v5556_v29  ;;  %4812 = vmatprep.mubr.msk.f32.mxu1 %vm289_vm1, %v5559_v30  ;;  %v5902_v30 = vld [vmem:[%s5427_s15 + $0x152] sm:$0xff] }
  0x34   : > { %4786 = vmatmul.mubr.msk.f32.gmra.mxu0 %vm289_vm1, %v5570_v31  ;;  %4813 = vmatmul.mubr.msk.f32.gmra.mxu1 %vm289_vm1, %v5573_v32  ;;  %v5882_v32 = vld [vmem:[%s5427_s15 + $0x168] sm:$0xff] }
  0x35   : > { %4788 = vmatprep.mubr.msk.f32.mxu0 %vm289_vm1, %v5576_v33  ;;  %4817 = vmatprep.mubr.msk.f32.mxu1 %vm289_vm1, %v222_v34  ;;  %v5762_v34 = vld [vmem:[%s5427_s15 + $0xd8] sm:$0xff] }
  0x38   : > { %4789 = vmatmul.mubr.msk.f32.gmra.mxu0 %vm289_vm1, %v5587_v35  ;;  %4818 = vmatmul.mubr.msk.f32.vlgmr.msra.gmra.mxu1 %vm289_vm1, %v223_v36  ;;  %v5765_v36 = vld [vmem:[%s5427_s15 + $0xaa] sm:$0xff] }
  0x39   : > { %4791 = vmatprep.mubr.msk.f32.mxu0 %vm289_vm1, %v5591_v37  ;;  %4820 = vmatprep.mubr.msk.f32.mxu1 %vm289_vm1, %v5594_v38  ;;  %6977 = vst [vmem:[#allocation19_spill] sm:$0xff] %v5765_v36 }
  0x3a   : > { %4916 = vmatpush3.msk.msra.mxu1 %vm386_vm0, %v5452_v9  ;;  %v5756_v9 = vld [vmem:[%s5427_s15 + $0xc8] sm:$0xff] }
  0x3b   : > { %5015 = vmatprep.subr.msk.mxu1 %vm386_vm0, %v5602_v39 }
  0x3c   : > { %4792 = vmatmul.mubr.msk.f32.gmra.mxu0 %vm289_vm1, %v5609_v40  ;;  %4821 = vmatmul.mubr.msk.f32.gmra.mxu1 %vm289_vm1, %v5612_v41 }
  0x3d   : > { %4823 = vmatprep.mubr.msk.f32.mxu1 %vm289_vm1, %v5617_v42  ;;  %4867 = vmatprep.mubr.msk.f32.mxu0 %vm289_vm1, %v939_v43  ;;  %v5776_v43 = vld [vmem:[%s5427_s15 + $0xe0] sm:$0xff] }
  0x40   : > { %4824 = vmatmul.mubr.msk.f32.gmra.mxu1 %vm289_vm1, %v5630_v44  ;;  %4868 = vmatmul.mubr.msk.f32.vlgmr.msra.gmra.mxu0 %vm289_vm1, %v940_v45  ;;  %v5779_v45 = vld [vmem:[%s5427_s15 + $0xb2] sm:$0xff] }
  0x41   : > { %4966 = vmatpush3.msk.msra.mxu0 %vm386_vm0, %v5457_v10  ;;  %4826 = vmatprep.mubr.msk.f32.mxu1 %vm289_vm1, %v5634_v46  ;;  %v5759_v10 = vld [vmem:[%s5427_s15 + $0x9a] sm:$0xff]  ;;  %6978 = vst [vmem:[#allocation20_spill] sm:$0xff] %v5779_v45 }
  0x42   : > { %4870 = vmatprep.mubr.msk.f32.mxu0 %vm289_vm1, %v5637_v47  ;;  %5065 = vmatprep.subr.msk.mxu0 %vm386_vm0, %v5642_v48  ;;  %6976 = vst [vmem:[#allocation18_spill] sm:$0xff] %v5759_v10  ;;  %v5885_v47 = vld [vmem:[%s5427_s15 + $0x13a] sm:$0xff] }
  0x43   : > { %6989 = vst [vmem:[#allocation31_spill] sm:$0xff] %v5885_v47 }
  0x44   : > { %4827 = vmatmul.mubr.msk.f32.gmra.mxu1 %vm289_vm1, %v5652_v49  ;;  %4871 = vmatmul.mubr.msk.f32.gmra.mxu0 %vm289_vm1, %v5655_v50  ;;  %v5865_v50 = vld [vmem:[%s5427_s15 + $0x122] sm:$0xff] }
  0x45   : > { %4829 = vmatprep.mubr.msk.f32.mxu1 %vm289_vm1, %v5660_v51  ;;  %4873 = vmatprep.mubr.msk.f32.mxu0 %vm289_vm1, %v5663_v52  ;;  %v5862_v52 = vld [vmem:[%s5427_s15 + $0x150] sm:$0xff]  ;;  %6987 = vst [vmem:[#allocation29_spill] sm:$0xff] %v5865_v50 }
  0x48   : > { %4830 = vmatmul.mubr.msk.f32.gmra.mxu1 %vm289_vm1, %v5676_v53  ;;  %4874 = vmatmul.mubr.msk.f32.gmra.mxu0 %vm289_vm1, %v5679_v54  ;;  %v5845_v54 = vld [vmem:[%s5427_s15 + $0x10a] sm:$0xff] }
  0x49   : > { %4832 = vmatprep.mubr.msk.f32.mxu1 %vm289_vm1, %v5682_v55  ;;  %4876 = vmatprep.mubr.msk.f32.mxu0 %vm289_vm1, %v5685_v56  ;;  %v5842_v56 = vld [vmem:[%s5427_s15 + $0x138] sm:$0xff]  ;;  %6985 = vst [vmem:[#allocation27_spill] sm:$0xff] %v5845_v54 }
  0x4c   : > { %4833 = vmatmul.mubr.msk.f32.gmra.mxu1 %vm289_vm1, %v5696_v57  ;;  %4877 = vmatmul.mubr.msk.f32.gmra.mxu0 %vm289_vm1, %v5699_v58  ;;  %v5825_v58 = vld [vmem:[%s5427_s15 + $0xf2] sm:$0xff] }
  0x4d   : > { %4835 = vmatprep.mubr.msk.f32.mxu1 %vm289_vm1, %v5702_v59  ;;  %4879 = vmatprep.mubr.msk.f32.mxu0 %vm289_vm1, %v5705_v60  ;;  %v5822_v60 = vld [vmem:[%s5427_s15 + $0x120] sm:$0xff]  ;;  %6983 = vst [vmem:[#allocation25_spill] sm:$0xff] %v5825_v58 }
  0x50   : > { %4836 = vmatmul.mubr.msk.f32.gmra.mxu1 %vm289_vm1, %v5716_v61  ;;  %4880 = vmatmul.mubr.msk.f32.gmra.mxu0 %vm289_vm1, %v5719_v62  ;;  %v5805_v62 = vld [vmem:[%s5427_s15 + $0xda] sm:$0xff] }
  0x51   : > { %4838 = vmatprep.mubr.msk.f32.mxu1 %vm289_vm1, %v5722_v63  ;;  %4882 = vmatprep.mubr.msk.f32.mxu0 %vm289_vm1, %v5725_v0  ;;  %v5802_v0 = vld [vmem:[%s5427_s15 + $0x108] sm:$0xff]  ;;  %6981 = vst [vmem:[#allocation23_spill] sm:$0xff] %v5805_v62 }
  0x54   : > { %4839 = vmatmul.mubr.msk.f32.gmra.mxu1 %vm289_vm1, %v5736_v1  ;;  %4883 = vmatmul.mubr.msk.f32.gmra.mxu0 %vm289_vm1, %v5739_v2  ;;  %v5785_v2 = vld [vmem:[%s5427_s15 + $0xc2] sm:$0xff] }
  0x55   : > { %4841 = vmatprep.mubr.msk.f32.mxu1 %vm289_vm1, %v5742_v3  ;;  %4885 = vmatprep.mubr.msk.f32.mxu0 %vm289_vm1, %v5745_v5  ;;  %v5782_v5 = vld [vmem:[%s5427_s15 + $0xf0] sm:$0xff]  ;;  %6979 = vst [vmem:[#allocation21_spill] sm:$0xff] %v5785_v2 }
  0x58   : > { %4842 = vmatmul.mubr.msk.f32.gmra.mxu1 %vm289_vm1, %v5756_v9  ;;  %4886 = vmatmul.mubr.msk.f32.gmra.mxu0 %vm289_vm1, %v5759_v10  ;;  %v5799_v10 = vld [vmem:[%s5427_s15 + $0xca] sm:$0xff] }
  0x59   : > { %4844 = vmatprep.mubr.msk.f32.mxu1 %vm289_vm1, %v5762_v34  ;;  %4888 = vmatprep.mubr.msk.f32.mxu0 %vm289_vm1, %v5765_v36  ;;  %v5796_v36 = vld [vmem:[%s5427_s15 + $0xf8] sm:$0xff]  ;;  %6980 = vst [vmem:[#allocation22_spill] sm:$0xff] %v5799_v10 }
  0x5c   : > { %4845 = vmatmul.mubr.msk.f32.gmra.mxu1 %vm289_vm1, %v5776_v43  ;;  %4889 = vmatmul.mubr.msk.f32.gmra.mxu0 %vm289_vm1, %v5779_v45  ;;  %v5819_v45 = vld [vmem:[%s5427_s15 + $0xe2] sm:$0xff] }
  0x5d   : > { %4847 = vmatprep.mubr.msk.f32.mxu1 %vm289_vm1, %v5782_v5  ;;  %4891 = vmatprep.mubr.msk.f32.mxu0 %vm289_vm1, %v5785_v2  ;;  %v5816_v2 = vld [vmem:[%s5427_s15 + $0x110] sm:$0xff]  ;;  %6982 = vst [vmem:[#allocation24_spill] sm:$0xff] %v5819_v45 }
  0x60   : > { %4848 = vmatmul.mubr.msk.f32.gmra.mxu1 %vm289_vm1, %v5796_v36  ;;  %4892 = vmatmul.mubr.msk.f32.gmra.mxu0 %vm289_vm1, %v5799_v10  ;;  %v5839_v10 = vld [vmem:[%s5427_s15 + $0xfa] sm:$0xff] }
  0x61   : > { %4850 = vmatprep.mubr.msk.f32.mxu1 %vm289_vm1, %v5802_v0  ;;  %4894 = vmatprep.mubr.msk.f32.mxu0 %vm289_vm1, %v5805_v62  ;;  %v5836_v62 = vld [vmem:[%s5427_s15 + $0x128] sm:$0xff]  ;;  %6984 = vst [vmem:[#allocation26_spill] sm:$0xff] %v5839_v10 }
  0x64   : > { %4851 = vmatmul.mubr.msk.f32.gmra.mxu1 %vm289_vm1, %v5816_v2  ;;  %4895 = vmatmul.mubr.msk.f32.gmra.mxu0 %vm289_vm1, %v5819_v45  ;;  %v5859_v45 = vld [vmem:[%s5427_s15 + $0x112] sm:$0xff] }
  0x65   : > { %4853 = vmatprep.mubr.msk.f32.mxu1 %vm289_vm1, %v5822_v60  ;;  %4897 = vmatprep.mubr.msk.f32.mxu0 %vm289_vm1, %v5825_v58  ;;  %v5856_v58 = vld [vmem:[%s5427_s15 + $0x140] sm:$0xff]  ;;  %6986 = vst [vmem:[#allocation28_spill] sm:$0xff] %v5859_v45 }
  0x68   : > { %4854 = vmatmul.mubr.msk.f32.gmra.mxu1 %vm289_vm1, %v5836_v62  ;;  %4898 = vmatmul.mubr.msk.f32.gmra.mxu0 %vm289_vm1, %v5839_v10  ;;  %v5879_v10 = vld [vmem:[%s5427_s15 + $0x12a] sm:$0xff] }
  0x69   : > { %4856 = vmatprep.mubr.msk.f32.mxu1 %vm289_vm1, %v5842_v56  ;;  %4900 = vmatprep.mubr.msk.f32.mxu0 %vm289_vm1, %v5845_v54  ;;  %v5876_v54 = vld [vmem:[%s5427_s15 + $0x158] sm:$0xff]  ;;  %6988 = vst [vmem:[#allocation30_spill] sm:$0xff] %v5879_v10 }
  0x6c   : > { %4857 = vmatmul.mubr.msk.f32.gmra.mxu1 %vm289_vm1, %v5856_v58  ;;  %4901 = vmatmul.mubr.msk.f32.gmra.mxu0 %vm289_vm1, %v5859_v45  ;;  %v5899_v45 = vld [vmem:[%s5427_s15 + $0x142] sm:$0xff] }
  0x6d   : > { %4859 = vmatprep.mubr.msk.f32.mxu1 %vm289_vm1, %v5862_v52  ;;  %4903 = vmatprep.mubr.msk.f32.mxu0 %vm289_vm1, %v5865_v50  ;;  %v5896_v50 = vld [vmem:[%s5427_s15 + $0x170] sm:$0xff]  ;;  %6990 = vst [vmem:[#allocation32_spill] sm:$0xff] %v5899_v45 }
  0x70   : > { %4860 = vmatmul.mubr.msk.f32.gmra.mxu1 %vm289_vm1, %v5876_v54  ;;  %4904 = vmatmul.mubr.msk.f32.gmra.mxu0 %vm289_vm1, %v5879_v10  ;;  %v5913_v10 = vld [vmem:[%s5427_s15 + $0x15a] sm:$0xff] }
  0x71   : > { %4862 = vmatprep.mubr.msk.f32.mxu1 %vm289_vm1, %v5882_v32  ;;  %4906 = vmatprep.mubr.msk.f32.mxu0 %vm289_vm1, %v5885_v47  ;;  %v5916_v47 = vld [vmem:[%s5427_s15 + $0x16a] sm:$0xff] }
  0x74   : > { %4863 = vmatmul.mubr.msk.f32.gmra.mxu1 %vm289_vm1, %v5896_v50  ;;  %4907 = vmatmul.mubr.msk.f32.gmra.mxu0 %vm289_vm1, %v5899_v45  ;;  %v5925_v45 = vld [vmem:[%s6900_s1 + $0x1c] sm:$0xf] }
  0x75   : > { %4909 = vmatprep.mubr.msk.f32.mxu0 %vm289_vm1, %v5902_v30  ;;  %4917 = vmatprep.mubr.msk.f32.mxu1 %vm289_vm1, %v5594_v38  ;;  %v5932_v38 = vld [vmem:[%s5427_s15 + $0x172] sm:$0xff] }
  0x78   : > { %4910 = vmatmul.mubr.msk.f32.gmra.mxu0 %vm289_vm1, %v5913_v10  ;;  %4918 = vmatmul.mubr.msk.f32.vlgmr.msra.gmra.mxu1 %vm289_vm1, %v5612_v41  ;;  %v5949_v41 = vld [vmem:[%s6900_s1 + $0x20] sm:$0xf] }
  0x79   : > { %4912 = vmatprep.mubr.msk.f32.mxu0 %vm289_vm1, %v5916_v47  ;;  %4920 = vmatprep.mubr.msk.f32.mxu1 %vm289_vm1, %v5617_v42 }
  0x7a   : > { %5016 = vmatpush3.msk.msra.mxu1 %vm386_vm0, %v5602_v39  ;;  %v7004_v39 = vld [vmem:[#allocation16_spill] sm:$0xff] }
  0x7b   : > { %5115 = vmatprep.subr.msk.mxu1 %vm386_vm0, %v5925_v45 }
  0x7c   : > { %4913 = vmatmul.mubr.msk.f32.gmra.mxu0 %vm289_vm1, %v5932_v38  ;;  %4921 = vmatmul.mubr.msk.f32.gmra.mxu1 %vm289_vm1, %v5630_v44 }
  0x7d   : > { %4923 = vmatprep.mubr.msk.f32.mxu1 %vm289_vm1, %v5634_v46  ;;  %4967 = vmatprep.mubr.msk.f32.mxu0 %vm289_vm1, %v5441_v7  ;;  %v6991_v7 = vld [vmem:[#allocation5_spill] sm:$0xff] }
  0x80   : > { %4924 = vmatmul.mubr.msk.f32.gmra.mxu1 %vm289_vm1, %v5652_v49  ;;  %4968 = vmatmul.mubr.msk.f32.vlgmr.msra.gmra.mxu0 %vm289_vm1, %v5463_v11  ;;  %v6074_v11 = vld [vmem:[%s5427_s15 + $0x181] sm:$0xff] }
  0x81   : > { %5066 = vmatpush3.msk.msra.mxu0 %vm386_vm0, %v5642_v48  ;;  %4926 = vmatprep.mubr.msk.f32.mxu1 %vm289_vm1, %v5660_v51  ;;  %6993 = vst [vmem:[#allocation5_spill] sm:$0xff] %v6074_v11  ;;  %v7009_v48 = vld [vmem:[#allocation21_spill] sm:$0xff] }
  0x82   : > { %4970 = vmatprep.mubr.msk.f32.mxu0 %vm289_vm1, %v5472_v13  ;;  %5165 = vmatprep.subr.msk.mxu0 %vm386_vm0, %v5949_v41 }
  0x84   : > { %4927 = vmatmul.mubr.msk.f32.gmra.mxu1 %vm289_vm1, %v5676_v53  ;;  %4971 = vmatmul.mubr.msk.f32.gmra.mxu0 %vm289_vm1, %v5490_v15 }
  0x85   : > { %4929 = vmatprep.mubr.msk.f32.mxu1 %vm289_vm1, %v5682_v55  ;;  %4973 = vmatprep.mubr.msk.f32.mxu0 %vm289_vm1, %v5496_v17 }
  0x88   : > { %4930 = vmatmul.mubr.msk.f32.gmra.mxu1 %vm289_vm1, %v5696_v57  ;;  %4974 = vmatmul.mubr.msk.f32.gmra.mxu0 %vm289_vm1, %v5510_v19 }
  0x89   : > { %4932 = vmatprep.mubr.msk.f32.mxu1 %vm289_vm1, %v5702_v59  ;;  %4976 = vmatprep.mubr.msk.f32.mxu0 %vm289_vm1, %v5516_v21 }
  0x8c   : > { %4933 = vmatmul.mubr.msk.f32.gmra.mxu1 %vm289_vm1, %v5716_v61  ;;  %4977 = vmatmul.mubr.msk.f32.gmra.mxu0 %vm289_vm1, %v5530_v23 }
  0x8d   : > { %4935 = vmatprep.mubr.msk.f32.mxu1 %vm289_vm1, %v5722_v63  ;;  %4979 = vmatprep.mubr.msk.f32.mxu0 %vm289_vm1, %v5536_v25 }
  0x90   : > { %4936 = vmatmul.mubr.msk.f32.gmra.mxu1 %vm289_vm1, %v5736_v1  ;;  %4980 = vmatmul.mubr.msk.f32.gmra.mxu0 %vm289_vm1, %v5550_v27 }
  0x91   : > { %4938 = vmatprep.mubr.msk.f32.mxu1 %vm289_vm1, %v5742_v3  ;;  %4982 = vmatprep.mubr.msk.f32.mxu0 %vm289_vm1, %v5556_v29 }
  0x94   : > { %4939 = vmatmul.mubr.msk.f32.gmra.mxu1 %vm289_vm1, %v5756_v9  ;;  %4983 = vmatmul.mubr.msk.f32.gmra.mxu0 %vm289_vm1, %v5570_v31 }
  0x95   : > { %4941 = vmatprep.mubr.msk.f32.mxu1 %vm289_vm1, %v5762_v34  ;;  %4985 = vmatprep.mubr.msk.f32.mxu0 %vm289_vm1, %v5576_v33 }
  0x98   : > { %4942 = vmatmul.mubr.msk.f32.gmra.mxu1 %vm289_vm1, %v5776_v43  ;;  %4986 = vmatmul.mubr.msk.f32.gmra.mxu0 %vm289_vm1, %v5587_v35 }
  0x99   : > { %4944 = vmatprep.mubr.msk.f32.mxu1 %vm289_vm1, %v5782_v5  ;;  %4988 = vmatprep.mubr.msk.f32.mxu0 %vm289_vm1, %v5591_v37  ;;  %v7003_v37 = vld [vmem:[#allocation15_spill] sm:$0xff] }
  0x9c   : > { %4945 = vmatmul.mubr.msk.f32.gmra.mxu1 %vm289_vm1, %v5796_v36  ;;  %4989 = vmatmul.mubr.msk.f32.gmra.mxu0 %vm289_vm1, %v5609_v40  ;;  %v7005_v40 = vld [vmem:[#allocation17_spill] sm:$0xff] }
  0x9d   : > { %4947 = vmatprep.mubr.msk.f32.mxu1 %vm289_vm1, %v5802_v0  ;;  %4991 = vmatprep.mubr.msk.f32.mxu0 %vm289_vm1, %v5431_v4  ;;  %v6052_v4 = vld [vmem:[%s5427_s15 + $0x180] sm:$0xff] }
  0xa0   : > { %4948 = vmatmul.mubr.msk.f32.gmra.mxu1 %vm289_vm1, %v5816_v2  ;;  %4992 = vmatmul.mubr.msk.f32.gmra.mxu0 %vm289_vm1, %v5438_v6  ;;  %v6063_v6 = vld [vmem:[%s5427_s15 + $0x188] sm:$0xff] }
  0xa1   : > { %4950 = vmatprep.mubr.msk.f32.mxu1 %vm289_vm1, %v5822_v60  ;;  %4994 = vmatprep.mubr.msk.f32.mxu0 %vm289_vm1, %v5444_v8  ;;  %v6992_v8 = vld [vmem:[#allocation7_spill] sm:$0xff] }
  0xa4   : > { %4951 = vmatmul.mubr.msk.f32.gmra.mxu1 %vm289_vm1, %v5836_v62  ;;  %4995 = vmatmul.mubr.msk.f32.gmra.mxu0 %vm289_vm1, %v5466_v12  ;;  %v6994_v12 = vld [vmem:[#allocation6_spill] sm:$0xff] }
  0xa5   : > { %4953 = vmatprep.mubr.msk.f32.mxu1 %vm289_vm1, %v5842_v56  ;;  %4997 = vmatprep.mubr.msk.f32.mxu0 %vm289_vm1, %v5475_v14  ;;  %v6995_v14 = vld [vmem:[#allocation8_spill] sm:$0xff] }
  0xa8   : > { %4954 = vmatmul.mubr.msk.f32.gmra.mxu1 %vm289_vm1, %v5856_v58  ;;  %4998 = vmatmul.mubr.msk.f32.gmra.mxu0 %vm289_vm1, %v5493_v16  ;;  %v6996_v16 = vld [vmem:[#allocation9_spill] sm:$0xff] }
  0xa9   : > { %4956 = vmatprep.mubr.msk.f32.mxu1 %vm289_vm1, %v5862_v52  ;;  %5000 = vmatprep.mubr.msk.f32.mxu0 %vm289_vm1, %v5499_v18  ;;  %v6085_v18 = vld [vmem:[%s5427_s15 + $0x189] sm:$0xff] }
  0xaa   : > { %6997 = vst [vmem:[#allocation7_spill] sm:$0xff] %v6085_v18 }
  0xac   : > { %4957 = vmatmul.mubr.msk.f32.gmra.mxu1 %vm289_vm1, %v5876_v54  ;;  %5001 = vmatmul.mubr.msk.f32.gmra.mxu0 %vm289_vm1, %v5513_v20  ;;  %v6998_v20 = vld [vmem:[#allocation10_spill] sm:$0xff] }
  0xad   : > { %4959 = vmatprep.mubr.msk.f32.mxu1 %vm289_vm1, %v5882_v32  ;;  %5003 = vmatprep.mubr.msk.f32.mxu0 %vm289_vm1, %v5519_v22  ;;  %v6999_v22 = vld [vmem:[#allocation11_spill] sm:$0xff] }
  0xb0   : > { %4960 = vmatmul.mubr.msk.f32.gmra.mxu1 %vm289_vm1, %v5896_v50  ;;  %5004 = vmatmul.mubr.msk.f32.gmra.mxu0 %vm289_vm1, %v5533_v24  ;;  %v7000_v24 = vld [vmem:[#allocation12_spill] sm:$0xff] }
  0xb1   : > { %4962 = vmatprep.mubr.msk.f32.mxu1 %vm289_vm1, %v6052_v4  ;;  %5006 = vmatprep.mubr.msk.f32.mxu0 %vm289_vm1, %v5539_v26  ;;  %v7001_v26 = vld [vmem:[#allocation13_spill] sm:$0xff] }
  0xb4   : > { %4963 = vmatmul.mubr.msk.f32.gmra.mxu1 %vm289_vm1, %v6063_v6  ;;  %5007 = vmatmul.mubr.msk.f32.gmra.mxu0 %vm289_vm1, %v5553_v28  ;;  %v7002_v28 = vld [vmem:[#allocation14_spill] sm:$0xff] }
  0xb5   : > { %5009 = vmatprep.mubr.msk.f32.mxu0 %vm289_vm1, %v6991_v7  ;;  %5017 = vmatprep.mubr.msk.f32.mxu1 %vm289_vm1, %v6992_v8 }
  0xb8   : > { %5010 = vmatmul.mubr.msk.f32.gmra.mxu0 %vm289_vm1, %v6994_v12  ;;  %5018 = vmatmul.mubr.msk.f32.vlgmr.msra.gmra.mxu1 %vm289_vm1, %v6995_v14  ;;  %v7018_v12 = vld [vmem:[#allocation30_spill] sm:$0xff] }
  0xb9   : > { %5012 = vmatprep.mubr.msk.f32.mxu0 %vm289_vm1, %v6074_v11  ;;  %5020 = vmatprep.mubr.msk.f32.mxu1 %vm289_vm1, %v6996_v16 }
  0xba   : > { %5116 = vmatpush3.msk.msra.mxu1 %vm386_vm0, %v5925_v45  ;;  %v7016_v45 = vld [vmem:[#allocation28_spill] sm:$0xff] }
  0xbc   : > { %5013 = vmatmul.mubr.msk.f32.gmra.mxu0 %vm289_vm1, %v6085_v18  ;;  %5021 = vmatmul.mubr.msk.f32.gmra.mxu1 %vm289_vm1, %v6998_v20 }
  0xbd   : > { %5023 = vmatprep.mubr.msk.f32.mxu1 %vm289_vm1, %v6999_v22  ;;  %5067 = vmatprep.mubr.msk.f32.mxu0 %vm289_vm1, %v5617_v42  ;;  %v7006_v42 = vld [vmem:[#allocation18_spill] sm:$0xff] }
  0xc0   : > { %5024 = vmatmul.mubr.msk.f32.gmra.mxu1 %vm289_vm1, %v7000_v24  ;;  %5068 = vmatmul.mubr.msk.f32.vlgmr.msra.gmra.mxu0 %vm289_vm1, %v5630_v44  ;;  %v7007_v44 = vld [vmem:[#allocation19_spill] sm:$0xff] }
  0xc1   : > { %5166 = vmatpush3.msk.msra.mxu0 %vm386_vm0, %v5949_v41  ;;  %5026 = vmatprep.mubr.msk.f32.mxu1 %vm289_vm1, %v7001_v26 }
  0xc2   : > { %5070 = vmatprep.mubr.msk.f32.mxu0 %vm289_vm1, %v5634_v46  ;;  %v7008_v46 = vld [vmem:[#allocation20_spill] sm:$0xff] }
  0xc4   : > { %5027 = vmatmul.mubr.msk.f32.gmra.mxu1 %vm289_vm1, %v7002_v28  ;;  %5071 = vmatmul.mubr.msk.f32.gmra.mxu0 %vm289_vm1, %v5652_v49  ;;  %v7010_v49 = vld [vmem:[#allocation22_spill] sm:$0xff] }
  0xc5   : > { %5029 = vmatprep.mubr.msk.f32.mxu1 %vm289_vm1, %v7003_v37  ;;  %5073 = vmatprep.mubr.msk.f32.mxu0 %vm289_vm1, %v5660_v51  ;;  %v7011_v51 = vld [vmem:[#allocation23_spill] sm:$0xff] }
  0xc8   : > { %5030 = vmatmul.mubr.msk.f32.gmra.mxu1 %vm289_vm1, %v7004_v39  ;;  %5074 = vmatmul.mubr.msk.f32.gmra.mxu0 %vm289_vm1, %v5676_v53  ;;  %v7012_v53 = vld [vmem:[#allocation24_spill] sm:$0xff] }
  0xc9   : > { %5032 = vmatprep.mubr.msk.f32.mxu1 %vm289_vm1, %v7005_v40  ;;  %5076 = vmatprep.mubr.msk.f32.mxu0 %vm289_vm1, %v5682_v55  ;;  %v7013_v55 = vld [vmem:[#allocation25_spill] sm:$0xff] }
  0xcc   : > { %5033 = vmatmul.mubr.msk.f32.gmra.mxu1 %vm289_vm1, %v7006_v42  ;;  %5077 = vmatmul.mubr.msk.f32.gmra.mxu0 %vm289_vm1, %v5696_v57 }
  0xcd   : > { %5035 = vmatprep.mubr.msk.f32.mxu1 %vm289_vm1, %v7007_v44  ;;  %5079 = vmatprep.mubr.msk.f32.mxu0 %vm289_vm1, %v5702_v59 }
  0xd0   : > { %5036 = vmatmul.mubr.msk.f32.gmra.mxu1 %vm289_vm1, %v7008_v46  ;;  %5080 = vmatmul.mubr.msk.f32.gmra.mxu0 %vm289_vm1, %v5716_v61  ;;  %v7014_v61 = vld [vmem:[#allocation26_spill] sm:$0xff] }
  0xd1   : > { %5038 = vmatprep.mubr.msk.f32.mxu1 %vm289_vm1, %v7009_v48  ;;  %5082 = vmatprep.mubr.msk.f32.mxu0 %vm289_vm1, %v5722_v63  ;;  %v7015_v63 = vld [vmem:[#allocation27_spill] sm:$0xff] }
  0xd4   : > { %5039 = vmatmul.mubr.msk.f32.gmra.mxu1 %vm289_vm1, %v7010_v49  ;;  %5083 = vmatmul.mubr.msk.f32.gmra.mxu0 %vm289_vm1, %v5736_v1 }
  0xd5   : > { %5041 = vmatprep.mubr.msk.f32.mxu1 %vm289_vm1, %v7011_v51  ;;  %5085 = vmatprep.mubr.msk.f32.mxu0 %vm289_vm1, %v5742_v3 }
  0xd8   : > { %5042 = vmatmul.mubr.msk.f32.gmra.mxu1 %vm289_vm1, %v7012_v53  ;;  %5086 = vmatmul.mubr.msk.f32.gmra.mxu0 %vm289_vm1, %v5756_v9 }
  0xd9   : > { %5044 = vmatprep.mubr.msk.f32.mxu1 %vm289_vm1, %v7013_v55  ;;  %5088 = vmatprep.mubr.msk.f32.mxu0 %vm289_vm1, %v5762_v34 }
  0xdc   : > { %v6155_v57 = vpop.f32.mrf.mxu0  ;;  %v6157_v59 = vpop.f32.mrf.mxu1  ;;  %5045 = vmatmul.mubr.msk.f32.gmra.mxu1 %vm289_vm1, %v7014_v61  ;;  %5089 = vmatmul.mubr.msk.f32.gmra.mxu0 %vm289_vm1, %v5776_v43  ;;  %v7017_v43 = vld [vmem:[#allocation29_spill] sm:$0xff] }
  0xdd   : > { %5047 = vmatprep.mubr.msk.f32.mxu1 %vm289_vm1, %v7015_v63  ;;  %5091 = vmatprep.mubr.msk.f32.mxu0 %vm289_vm1, %v5782_v5 }
  0xde   : > { %v6167_v1 = vpop.f32.mrf.mxu0  ;;  %v6169_v3 = vpop.f32.mrf.mxu1 }
  0xe0   : > { %v6171_v9 = vpop.f32.mrf.mxu0  ;;  %v6173_v34 = vpop.f32.mrf.mxu1  ;;  %5048 = vmatmul.mubr.msk.f32.gmra.mxu1 %vm289_vm1, %v7016_v45  ;;  %5092 = vmatmul.mubr.msk.f32.gmra.mxu0 %vm289_vm1, %v5796_v36  ;;  %v7019_v36 = vld [vmem:[#allocation31_spill] sm:$0xff] }
  0xe1   : > { %5050 = vmatprep.mubr.msk.f32.mxu1 %vm289_vm1, %v7017_v43  ;;  %5094 = vmatprep.mubr.msk.f32.mxu0 %vm289_vm1, %v5802_v0  ;;  %v7021_v43 = vld [vmem:[#allocation32_spill] sm:$0xff] }
  0xe2   : > { %v6183_v5 = vpop.f32.mrf.mxu0  ;;  %v6185_v41 = vpop.f32.mrf.mxu1 }
  0xe4   : > { %v6187_v7 = vpop.f32.mrf.mxu0  ;;  %v6189_v8 = vpop.f32.mrf.mxu1  ;;  %5051 = vmatmul.mubr.msk.f32.gmra.mxu1 %vm289_vm1, %v7018_v12  ;;  %5095 = vmatmul.mubr.msk.f32.gmra.mxu0 %vm289_vm1, %v5816_v2 }
  0xe5   : > { %5053 = vmatprep.mubr.msk.f32.mxu1 %vm289_vm1, %v7019_v36  ;;  %5097 = vmatprep.mubr.msk.f32.mxu0 %vm289_vm1, %v5822_v60 }
  0xe6   : > { %v6199_v0 = vpop.f32.mrf.mxu0  ;;  %v6201_v14 = vpop.f32.mrf.mxu1 }
  0xe8   : > { %v6203_v18 = vpop.f32.mrf.mxu0  ;;  %v6205_v11 = vpop.f32.mrf.mxu1  ;;  %5054 = vmatmul.mubr.msk.f32.gmra.mxu1 %vm289_vm1, %v7021_v43  ;;  %5098 = vmatmul.mubr.msk.f32.gmra.mxu0 %vm289_vm1, %v5836_v62  ;;  %v6236_v62 = vld [vmem:[%s5427_s15 + $0x182] sm:$0xff] }
  0xe9   : > { %7020 = vst [vmem:[#allocation6_spill] sm:$0xff] %v6205_v11  ;;  %5056 = vmatprep.mubr.msk.f32.mxu1 %vm289_vm1, %v5902_v30  ;;  %5100 = vmatprep.mubr.msk.f32.mxu0 %vm289_vm1, %v5842_v56  ;;  %7024 = vst [vmem:[#allocation10_spill] sm:$0xff] %v6236_v62 }
  0xea   : > { %v6215_v60 = vpop.f32.mrf.mxu0  ;;  %v6217_v2 = vpop.f32.mrf.mxu1 }
  0xec   : > { %v6219_v36 = vpop.f32.mrf.mxu0  ;;  %v6221_v11 = vpop.f32.mrf.mxu1  ;;  %5057 = vmatmul.mubr.msk.f32.gmra.mxu1 %vm289_vm1, %v5913_v10  ;;  %5101 = vmatmul.mubr.msk.f32.gmra.mxu0 %vm289_vm1, %v5856_v58 }
  0xed   : > { %7022 = vst [vmem:[#allocation8_spill] sm:$0xff] %v6221_v11  ;;  %5059 = vmatprep.mubr.msk.f32.mxu1 %vm289_vm1, %v5916_v47  ;;  %5103 = vmatprep.mubr.msk.f32.mxu0 %vm289_vm1, %v5862_v52  ;;  %v6251_v47 = vld [vmem:[%s5427_s15 + $0x18a] sm:$0xff] }
  0xee   : > { %v6231_v30 = vpop.f32.mrf.mxu0  ;;  %v6233_v56 = vpop.f32.mrf.mxu1  ;;  %7026 = vst [vmem:[#allocation12_spill] sm:$0xff] %v6251_v47 }
  0xef   : > { %7023 = vst [vmem:[#allocation9_spill] sm:$0xff] %v6233_v56 }
  0xf0   : > { %v6238_v43 = vpop.f32.mrf.mxu0  ;;  %v6240_v11 = vpop.f32.mrf.mxu1  ;;  %5060 = vmatmul.mubr.msk.f32.gmra.mxu1 %vm289_vm1, %v5932_v38  ;;  %5104 = vmatmul.mubr.msk.f32.gmra.mxu0 %vm289_vm1, %v5876_v54  ;;  %v4293_v38 = vld [vmem:[%s5427_s15 + $0x198] sm:$0xff] }
  0xf1   : > { %7025 = vst [vmem:[#allocation11_spill] sm:$0xff] %v6240_v11  ;;  %5062 = vmatprep.mubr.msk.f32.mxu1 %vm289_vm1, %v6236_v62  ;;  %5106 = vmatprep.mubr.msk.f32.mxu0 %vm289_vm1, %v5882_v32 }
  0xf2   : > { %v6253_v52 = vpop.f32.mrf.mxu0  ;;  %v6255_v58 = vpop.f32.mrf.mxu1 }
  0xf3   : > { %7027 = vst [vmem:[#allocation13_spill] sm:$0xff] %v6255_v58 }
  0xf4   : > { %v6257_v10 = vpop.f32.mrf.mxu0  ;;  %v6259_v11 = vpop.f32.mrf.mxu1  ;;  %5063 = vmatmul.mubr.msk.f32.gmra.mxu1 %vm289_vm1, %v6251_v47  ;;  %5107 = vmatmul.mubr.msk.f32.gmra.mxu0 %vm289_vm1, %v5896_v50 }
  0xf5   : > { %7028 = vst [vmem:[#allocation14_spill] sm:$0xff] %v6259_v11  ;;  %5109 = vmatprep.mubr.msk.f32.mxu0 %vm289_vm1, %v6052_v4  ;;  %5117 = vmatprep.mubr.msk.f32.mxu1 %vm289_vm1, %v5472_v13  ;;  %v4294_v13 = vld [vmem:[%s5427_s15 + $0x1a0] sm:$0xff] }
  0xf6   : > { %v6269_v32 = vpop.f32.mrf.mxu0  ;;  %v6271_v54 = vpop.f32.mrf.mxu1 }
  0xf7   : > { %7029 = vst [vmem:[#allocation15_spill] sm:$0xff] %v6271_v54 }
  0xf8   : > { %v6274_v62 = vpop.f32.mrf.mxu0  ;;  %v4819_v11 = vpop.f32.mrf.mxu1  ;;  %5110 = vmatmul.mubr.msk.f32.gmra.mxu0 %vm289_vm1, %v6063_v6  ;;  %5118 = vmatmul.mubr.msk.f32.vlgmr.msra.gmra.mxu1 %vm289_vm1, %v5490_v15 }
  0xf9   : > { %v786_v50 = vadd.f32 %v4819_v11, %v6155_v57  ;;  %5112 = vmatprep.mubr.msk.f32.mxu0 %vm289_vm1, %v4293_v38  ;;  %5120 = vmatprep.mubr.msk.f32.mxu1 %vm289_vm1, %v5496_v17 }
  0xfa   : > { %v6285_v4 = vpop.f32.mrf.mxu0  ;;  %v780_v47 = vpop.f32.mrf.mxu1 }
  0xfb   : > { %v781_v54 = vadd.f32 %v780_v47, %v6167_v1 }
  0xfc   : > { %v6288_v58 = vpop.f32.mrf.mxu0  ;;  %v4822_v56 = vpop.f32.mrf.mxu1  ;;  %5113 = vmatmul.mubr.msk.f32.gmra.mxu0 %vm289_vm1, %v4294_v13  ;;  %5121 = vmatmul.mubr.msk.f32.gmra.mxu1 %vm289_vm1, %v5510_v19 }
  0xfd   : > { %v796_v15 = vadd.f32 %v4822_v56, %v6171_v9  ;;  %5123 = vmatprep.mubr.msk.f32.mxu1 %vm289_vm1, %v5516_v21  ;;  %5167 = vmatprep.mubr.msk.f32.mxu0 %vm289_vm1, %v6996_v16 }
  0xfe   : > { %v6298_v17 = vpop.f32.mrf.mxu0  ;;  %v790_v6 = vpop.f32.mrf.mxu1 }
  0xff   : > { %v791_v11 = vadd.f32 %v790_v6, %v6183_v5  ;;  %v4343_v6 = vld [vmem:[%s5427_s15 + $0xd9] sm:$0xff] }
 0x100   : > { %v4825_v57 = vpop.f32.mrf.mxu1  ;;  %v4869_v1 = vpop.f32.mrf.mxu0  ;;  %5124 = vmatmul.mubr.msk.f32.gmra.mxu1 %vm289_vm1, %v5530_v23  ;;  %5168 = vmatmul.mubr.msk.f32.vlgmr.msra.gmra.mxu0 %vm289_vm1, %v6998_v20 }
 0x101   : > { %v806_v19 = vadd.f32 %v4825_v57, %v6187_v7  ;;  %v6306_v9 = vadd.f32 %v4869_v1, %v786_v50  ;;  %5126 = vmatprep.mubr.msk.f32.mxu1 %vm289_vm1, %v5536_v25  ;;  %5170 = vmatprep.mubr.msk.f32.mxu0 %vm289_vm1, %v6999_v22 }
 0x102   : > { %v800_v21 = vpop.f32.mrf.mxu1  ;;  %v1138_v16 = vpop.f32.mrf.mxu0 }
 0x103   : > { %v801_v5 = vadd.f32 %v800_v21, %v6199_v0  ;;  %v6313_v56 = vadd.f32 %v1138_v16, %v781_v54  ;;  %v4345_v21 = vld [vmem:[%s5427_s15 + $0xf1] sm:$0xff] }
 0x104   : > { %v4828_v23 = vpop.f32.mrf.mxu1  ;;  %v4872_v47 = vpop.f32.mrf.mxu0  ;;  %5127 = vmatmul.mubr.msk.f32.gmra.mxu1 %vm289_vm1, %v5550_v27  ;;  %5171 = vmatmul.mubr.msk.f32.gmra.mxu0 %vm289_vm1, %v7000_v24 }
 0x105   : > { %v816_v20 = vadd.f32 %v4828_v23, %v6203_v18  ;;  %v6320_v25 = vadd.f32 %v4872_v47, %v796_v15  ;;  %5129 = vmatprep.mubr.msk.f32.mxu1 %vm289_vm1, %v5556_v29  ;;  %5173 = vmatprep.mubr.msk.f32.mxu0 %vm289_vm1, %v7001_v26 }
 0x106   : > { %v810_v22 = vpop.f32.mrf.mxu1  ;;  %v1148_v7 = vpop.f32.mrf.mxu0 }
 0x107   : > { %v811_v0 = vadd.f32 %v810_v22, %v6215_v60  ;;  %v6327_v54 = vadd.f32 %v1148_v7, %v791_v11  ;;  %v4341_v60 = vld [vmem:[%s5427_s15 + $0xc1] sm:$0xff]  ;;  %v4347_v22 = vld [vmem:[%s5427_s15 + $0x109] sm:$0xff] }
 0x108   : > { %v4831_v27 = vpop.f32.mrf.mxu1  ;;  %v4875_v38 = vpop.f32.mrf.mxu0  ;;  %5130 = vmatmul.mubr.msk.f32.gmra.mxu1 %vm289_vm1, %v5570_v31  ;;  %5174 = vmatmul.mubr.msk.f32.gmra.mxu0 %vm289_vm1, %v7002_v28 }
 0x109   : > { %v826_v29 = vadd.f32 %v4831_v27, %v6219_v36  ;;  %v6334_v18 = vadd.f32 %v4875_v38, %v806_v19  ;;  %5132 = vmatprep.mubr.msk.f32.mxu1 %vm289_vm1, %v5576_v33  ;;  %5176 = vmatprep.mubr.msk.f32.mxu0 %vm289_vm1, %v7003_v37  ;;  %v4342_v37 = vld [vmem:[%s5427_s15 + $0xc9] sm:$0xff] }
 0x10a   : > { %v820_v24 = vpop.f32.mrf.mxu1  ;;  %v1158_v26 = vpop.f32.mrf.mxu0 }
 0x10b   : > { %v821_v31 = vadd.f32 %v820_v24, %v6231_v30  ;;  %v6342_v50 = vadd.f32 %v1158_v26, %v801_v5  ;;  %v4349_v24 = vld [vmem:[%s5427_s15 + $0x121] sm:$0xff] }
 0x10c   : > { %v4834_v28 = vpop.f32.mrf.mxu1  ;;  %v4878_v13 = vpop.f32.mrf.mxu0  ;;  %5133 = vmatmul.mubr.msk.f32.gmra.mxu1 %vm289_vm1, %v5587_v35  ;;  %5177 = vmatmul.mubr.msk.f32.gmra.mxu0 %vm289_vm1, %v7004_v39 }
 0x10d   : > { %v836_v33 = vadd.f32 %v4834_v28, %v6238_v43  ;;  %v6349_v36 = vadd.f32 %v4878_v13, %v816_v20  ;;  %5135 = vmatprep.mubr.msk.f32.mxu1 %vm289_vm1, %v4341_v60  ;;  %5179 = vmatprep.mubr.msk.f32.mxu0 %vm289_vm1, %v7005_v40  ;;  %v4344_v40 = vld [vmem:[%s5427_s15 + $0xe1] sm:$0xff] }
 0x10e   : > { %v830_v30 = vpop.f32.mrf.mxu1  ;;  %v1168_v15 = vpop.f32.mrf.mxu0 }
 0x10f   : > { %v831_v35 = vadd.f32 %v830_v30, %v6253_v52  ;;  %v6357_v11 = vadd.f32 %v1168_v15, %v811_v0 }
 0x110   : > { %v4837_v39 = vpop.f32.mrf.mxu1  ;;  %v4881_v57 = vpop.f32.mrf.mxu0  ;;  %5136 = vmatmul.mubr.msk.f32.gmra.mxu1 %vm289_vm1, %v4342_v37  ;;  %5180 = vmatmul.mubr.msk.f32.gmra.mxu0 %vm289_vm1, %v7006_v42 }
 0x111   : > { %v846_v43 = vadd.f32 %v4837_v39, %v6257_v10  ;;  %v6363_v1 = vadd.f32 %v4881_v57, %v826_v29  ;;  %5138 = vmatprep.mubr.msk.f32.mxu1 %vm289_vm1, %v4343_v6  ;;  %5182 = vmatprep.mubr.msk.f32.mxu0 %vm289_vm1, %v7007_v44  ;;  %v4346_v44 = vld [vmem:[%s5427_s15 + $0xf9] sm:$0xff]  ;;  %v4353_v57 = vld [vmem:[%s5427_s15 + $0x151] sm:$0xff] }
 0x112   : > { %v840_v52 = vpop.f32.mrf.mxu1  ;;  %v1178_v19 = vpop.f32.mrf.mxu0 }
 0x113   : > { %v841_v16 = vadd.f32 %v840_v52, %v6269_v32  ;;  %v6371_v5 = vadd.f32 %v1178_v19, %v821_v31 }
 0x114   : > { %v4840_v42 = vpop.f32.mrf.mxu1  ;;  %v4884_v23 = vpop.f32.mrf.mxu0  ;;  %5139 = vmatmul.mubr.msk.f32.gmra.mxu1 %vm289_vm1, %v4344_v40  ;;  %5183 = vmatmul.mubr.msk.f32.gmra.mxu0 %vm289_vm1, %v7008_v46 }
 0x115   : > { %v856_v10 = vadd.f32 %v4840_v42, %v6274_v62  ;;  %v6377_v47 = vadd.f32 %v4884_v23, %v836_v33  ;;  %5141 = vmatprep.mubr.msk.f32.mxu1 %vm289_vm1, %v4345_v21  ;;  %5185 = vmatprep.mubr.msk.f32.mxu0 %vm289_vm1, %v7009_v48  ;;  %v4348_v48 = vld [vmem:[%s5427_s15 + $0x111] sm:$0xff]  ;;  %v4351_v33 = vld [vmem:[%s5427_s15 + $0x139] sm:$0xff] }
 0x116   : > { %v850_v32 = vpop.f32.mrf.mxu1  ;;  %v1188_v20 = vpop.f32.mrf.mxu0 }
 0x117   : > { %v851_v7 = vadd.f32 %v850_v32, %v6285_v4  ;;  %v6385_v0 = vadd.f32 %v1188_v20, %v831_v35  ;;  %v7032_v20 = vld [vmem:[#allocation31_spill] sm:$0xff] }
 0x118   : > { %v4843_v46 = vpop.f32.mrf.mxu1  ;;  %v4887_v27 = vpop.f32.mrf.mxu0  ;;  %5142 = vmatmul.mubr.msk.f32.gmra.mxu1 %vm289_vm1, %v4346_v44  ;;  %5186 = vmatmul.mubr.msk.f32.gmra.mxu0 %vm289_vm1, %v7010_v49 }
 0x119   : > { %v866_v62 = vadd.f32 %v4843_v46, %v6288_v58  ;;  %v6391_v38 = vadd.f32 %v4887_v27, %v846_v43  ;;  %5144 = vmatprep.mubr.msk.f32.mxu1 %vm289_vm1, %v4347_v22  ;;  %5188 = vmatprep.mubr.msk.f32.mxu0 %vm289_vm1, %v7011_v51  ;;  %v4350_v51 = vld [vmem:[%s5427_s15 + $0x129] sm:$0xff]  ;;  %v4419_v46 = vld [vmem:[%s5427_s15 + $0x152] sm:$0xff] }
 0x11a   : > { %v860_v4 = vpop.f32.mrf.mxu1  ;;  %v1198_v29 = vpop.f32.mrf.mxu0 }
 0x11b   : > { %v6398_v26 = vadd.f32 %v1198_v29, %v841_v16  ;;  %v4355_v16 = vld [vmem:[%s5427_s15 + $0x169] sm:$0xff]  ;;  %v7034_v29 = vld [vmem:[#allocation8_spill] sm:$0xff] }
 0x11c   : > { %v4846_v60 = vpop.f32.mrf.mxu1  ;;  %v4890_v31 = vpop.f32.mrf.mxu0  ;;  %5145 = vmatmul.mubr.msk.f32.gmra.mxu1 %vm289_vm1, %v4348_v48  ;;  %5189 = vmatmul.mubr.msk.f32.gmra.mxu0 %vm289_vm1, %v7012_v53 }
 0x11d   : > { %v876_v49 = vadd.f32 %v4846_v60, %v6157_v59  ;;  %v6404_v58 = vadd.f32 %v4890_v31, %v856_v10  ;;  %5147 = vmatprep.mubr.msk.f32.mxu1 %vm289_vm1, %v4349_v24  ;;  %5191 = vmatprep.mubr.msk.f32.mxu0 %vm289_vm1, %v7013_v55  ;;  %v861_v59 = vadd.f32 %v860_v4, %v6298_v17  ;;  %v7033_v4 = vld [vmem:[#allocation32_spill] sm:$0xff]  ;;  %v7035_v31 = vld [vmem:[#allocation5_spill] sm:$0xff] }
 0x11e   : > { %v870_v28 = vpop.f32.mrf.mxu1  ;;  %v1208_v13 = vpop.f32.mrf.mxu0 }
 0x11f   : > { %v871_v37 = vadd.f32 %v870_v28, %v6169_v3  ;;  %v6412_v30 = vadd.f32 %v1208_v13, %v851_v7  ;;  %v4352_v3 = vld [vmem:[%s5427_s15 + $0x141] sm:$0xff]  ;;  %v4359_v28 = vld [vmem:[%s5427_s15 + $0x199] sm:$0xff]  ;;  %v4421_v13 = vld [vmem:[%s5427_s15 + $0x16a] sm:$0xff] }
 0x120   : > { %v4849_v53 = vpop.f32.mrf.mxu1  ;;  %v4893_v15 = vpop.f32.mrf.mxu0  ;;  %5148 = vmatmul.mubr.msk.f32.gmra.mxu1 %vm289_vm1, %v4350_v51  ;;  %5192 = vmatmul.mubr.msk.f32.gmra.mxu0 %vm289_vm1, %v7014_v61 }
 0x121   : > { %v886_v55 = vadd.f32 %v4849_v53, %v6173_v34  ;;  %v6419_v6 = vadd.f32 %v4893_v15, %v866_v62  ;;  %5150 = vmatprep.mubr.msk.f32.mxu1 %vm289_vm1, %v4351_v33  ;;  %5194 = vmatprep.mubr.msk.f32.mxu0 %vm289_vm1, %v7015_v63  ;;  %v7030_v63 = vld [vmem:[#allocation29_spill] sm:$0xff] }
 0x122   : > { %v880_v35 = vpop.f32.mrf.mxu1  ;;  %v1218_v39 = vpop.f32.mrf.mxu0  ;;  %v7036_v33 = vld [vmem:[#allocation9_spill] sm:$0xff] }
 0x123   : > { %v881_v43 = vadd.f32 %v880_v35, %v6185_v41  ;;  %v6427_v61 = vadd.f32 %v1218_v39, %v861_v59  ;;  %v4354_v41 = vld [vmem:[%s5427_s15 + $0x159] sm:$0xff] }
 0x124   : > { %v4852_v17 = vpop.f32.mrf.mxu1  ;;  %v4896_v40 = vpop.f32.mrf.mxu0  ;;  %5151 = vmatmul.mubr.msk.f32.gmra.mxu1 %vm289_vm1, %v4352_v3  ;;  %5195 = vmatmul.mubr.msk.f32.gmra.mxu0 %vm289_vm1, %v7016_v45  ;;  %v7038_v3 = vld [vmem:[#allocation11_spill] sm:$0xff] }
 0x125   : > { %v896_v34 = vadd.f32 %v4852_v17, %v6189_v8  ;;  %v6433_v52 = vadd.f32 %v4896_v40, %v876_v49  ;;  %5153 = vmatprep.mubr.msk.f32.mxu1 %vm289_vm1, %v4353_v57  ;;  %5197 = vmatprep.mubr.msk.f32.mxu0 %vm289_vm1, %v7030_v63  ;;  %v7031_v8 = vld [vmem:[#allocation6_spill] sm:$0xff]  ;;  %v4360_v57 = vld [vmem:[%s5427_s15 + $0x1a1] sm:$0xff] }
 0x126   : > { %v890_v19 = vpop.f32.mrf.mxu1  ;;  %v1228_v21 = vpop.f32.mrf.mxu0 }
 0x127   : > { %v891_v42 = vadd.f32 %v890_v19, %v6201_v14  ;;  %v6441_v23 = vadd.f32 %v1228_v21, %v871_v37  ;;  %v4356_v14 = vld [vmem:[%s5427_s15 + $0x171] sm:$0xff] }
 0x128   : > { %v4855_v45 = vpop.f32.mrf.mxu1  ;;  %v4899_v10 = vpop.f32.mrf.mxu0  ;;  %5154 = vmatmul.mubr.msk.f32.gmra.mxu1 %vm289_vm1, %v4354_v41  ;;  %5198 = vmatmul.mubr.msk.f32.gmra.mxu0 %vm289_vm1, %v7018_v12 }
 0x129   : > { %v906_v44 = vadd.f32 %v4855_v45, %v7031_v8  ;;  %v6447_v32 = vadd.f32 %v4899_v10, %v886_v55  ;;  %5156 = vmatprep.mubr.msk.f32.mxu1 %vm289_vm1, %v4355_v16  ;;  %5200 = vmatprep.mubr.msk.f32.mxu0 %vm289_vm1, %v7032_v20  ;;  %v7037_v55 = vld [vmem:[#allocation7_spill] sm:$0xff]  ;;  %v7040_v16 = vld [vmem:[#allocation14_spill] sm:$0xff]  ;;  %v4425_v20 = vld [vmem:[%s5427_s15 + $0x19a] sm:$0xff] }
 0x12a   : > { %v900_v22 = vpop.f32.mrf.mxu1  ;;  %v1238_v7 = vpop.f32.mrf.mxu0  ;;  %v7041_v10 = vld [vmem:[#allocation10_spill] sm:$0xff] }
 0x12b   : > { %v901_v27 = vadd.f32 %v900_v22, %v6217_v2  ;;  %v6455_v62 = vadd.f32 %v1238_v7, %v881_v43  ;;  %v4420_v2 = vld [vmem:[%s5427_s15 + $0x15a] sm:$0xff]  ;;  %v4422_v43 = vld [vmem:[%s5427_s15 + $0x172] sm:$0xff] }
 0x12c   : > { %v4858_v12 = vpop.f32.mrf.mxu1  ;;  %v4902_v48 = vpop.f32.mrf.mxu0  ;;  %5157 = vmatmul.mubr.msk.f32.gmra.mxu1 %vm289_vm1, %v4356_v14  ;;  %5201 = vmatmul.mubr.msk.f32.gmra.mxu0 %vm289_vm1, %v7033_v4  ;;  %v7042_v14 = vld [vmem:[#allocation15_spill] sm:$0xff] }
 0x12d   : > { %v916_v24 = vadd.f32 %v4858_v12, %v7034_v29  ;;  %v6461_v60 = vadd.f32 %v4902_v48, %v896_v34  ;;  %5159 = vmatprep.mubr.msk.f32.mxu1 %vm289_vm1, %v7035_v31  ;;  %5203 = vmatprep.mubr.msk.f32.mxu0 %vm289_vm1, %v4419_v46  ;;  %v7039_v34 = vld [vmem:[#allocation13_spill] sm:$0xff]  ;;  %v7043_v12 = vld [vmem:[#allocation12_spill] sm:$0xff] }
 0x12e   : > { %v910_v49 = vpop.f32.mrf.mxu1  ;;  %v1248_v51 = vpop.f32.mrf.mxu0  ;;  %v4426_v29 = vld [vmem:[%s5427_s15 + $0x1a2] sm:$0xff] }
 0x12f   : > { %v911_v37 = vadd.f32 %v910_v49, %v7036_v33  ;;  %v6470_v53 = vadd.f32 %v1248_v51, %v891_v42 }
 0x130   : > { %v4861_v15 = vpop.f32.mrf.mxu1  ;;  %v4905_v59 = vpop.f32.mrf.mxu0  ;;  %5160 = vmatmul.mubr.msk.f32.gmra.mxu1 %vm289_vm1, %v7037_v55  ;;  %5204 = vmatmul.mubr.msk.f32.gmra.mxu0 %vm289_vm1, %v4420_v2 }
 0x131   : > { %v926_v35 = vadd.f32 %v4861_v15, %v7038_v3  ;;  %v6476_v39 = vadd.f32 %v4905_v59, %v906_v44  ;;  %5162 = vmatprep.mubr.msk.f32.mxu1 %vm289_vm1, %v4359_v28  ;;  %5206 = vmatprep.mubr.msk.f32.mxu0 %vm289_vm1, %v4421_v13 }
 0x132   : > { %v920_v17 = vpop.f32.mrf.mxu1  ;;  %v1258_v40 = vpop.f32.mrf.mxu0 }
 0x133   : > { %v921_v63 = vadd.f32 %v920_v17, %v7039_v34  ;;  %v6483_v41 = vadd.f32 %v1258_v40, %v901_v27 }
 0x134   : > { %v4864_v19 = vpop.f32.mrf.mxu1  ;;  %v4908_v21 = vpop.f32.mrf.mxu0  ;;  %5163 = vmatmul.mubr.msk.f32.gmra.mxu1 %vm289_vm1, %v4360_v57  ;;  %5207 = vmatmul.mubr.msk.f32.gmra.mxu0 %vm289_vm1, %v4422_v43 }
 0x135   : > { %v936_v42 = vadd.f32 %v4864_v19, %v7040_v16  ;;  %v6488_v45 = vadd.f32 %v4908_v21, %v916_v24  ;;  %5209 = vmatprep.mubr.msk.f32.mxu0 %vm289_vm1, %v7041_v10 }
 0x136   : > { %v930_v8 = vpop.f32.mrf.mxu1  ;;  %v1268_v44 = vpop.f32.mrf.mxu0 }
 0x137   : > { %v931_v22 = vadd.f32 %v930_v8, %v7042_v14  ;;  %v6494_v7 = vadd.f32 %v1268_v44, %v911_v37 }
 0x138   : > { %v4911_v46 = vpop.f32.mrf.mxu0  ;;  %v4919_v27 = vpop.f32.mrf.mxu1  ;;  %5210 = vmatmul.mubr.msk.f32.gmra.mxu0 %vm289_vm1, %v7043_v12 }
 0x139   : > { %v6498_v48 = vadd.f32 %v4911_v46, %v926_v35  ;;  %v1689_v4 = vadd.f32 %v4919_v27, %v6306_v9  ;;  %5212 = vmatprep.mubr.msk.f32.mxu0 %vm289_vm1, %v4425_v20 }
 0x13a   : > { %v1278_v24 = vpop.f32.mrf.mxu0  ;;  %v1529_v31 = vpop.f32.mrf.mxu1 }
 0x13b   : > { %v6503_v2 = vadd.f32 %v1278_v24, %v921_v63  ;;  %v1688_v49 = vadd.f32 %v1529_v31, %v6313_v56 }
 0x13c   : > { %v4914_v51 = vpop.f32.mrf.mxu0  ;;  %v4922_v28 = vpop.f32.mrf.mxu1  ;;  %5213 = vmatmul.mubr.msk.f32.gmra.mxu0 %vm289_vm1, %v4426_v29 }
 0x13d   : > { %v6507_v13 = vadd.f32 %v4914_v51, %v936_v42  ;;  %v1691_v33 = vadd.f32 %v4922_v28, %v6320_v25 }
 0x13e   : > { %v1288_v37 = vpop.f32.mrf.mxu0  ;;  %v1539_v15 = vpop.f32.mrf.mxu1 }
 0x13f   : > { %v6510_v9 = vadd.f32 %v1288_v37, %v931_v22  ;;  %v1690_v59 = vadd.f32 %v1539_v15, %v6327_v54 }
 0x140   : > { %v4925_v55 = vpop.f32.mrf.mxu1  ;;  %v4969_v3 = vpop.f32.mrf.mxu0 }
 0x141   : > { %v1693_v35 = vadd.f32 %v4925_v55, %v6334_v18  ;;  %v6514_v57 = vadd.f32 %v4969_v3, %v1689_v4 }
 0x142   : > { %v1549_v56 = vpop.f32.mrf.mxu1  ;;  %v1919_v43 = vpop.f32.mrf.mxu0 }
 0x143   : > { %v1692_v17 = vadd.f32 %v1549_v56, %v6342_v50  ;;  %v6517_v40 = vadd.f32 %v1919_v43, %v1688_v49 }
 0x144   : > { %v4928_v34 = vpop.f32.mrf.mxu1  ;;  %v4972_v25 = vpop.f32.mrf.mxu0 }
 0x145   : > { %v1695_v63 = vadd.f32 %v4928_v34, %v6349_v36  ;;  %v6520_v19 = vadd.f32 %v4972_v25, %v1691_v33 }
 0x146   : > { %v1559_v21 = vpop.f32.mrf.mxu1  ;;  %v1929_v54 = vpop.f32.mrf.mxu0 }
 0x147   : > { %v1694_v16 = vadd.f32 %v1559_v21, %v6357_v11  ;;  %v6523_v42 = vadd.f32 %v1929_v54, %v1690_v59 }
 0x148   : > { %v4931_v18 = vpop.f32.mrf.mxu1  ;;  %v4975_v10 = vpop.f32.mrf.mxu0 }
 0x149   : > { %v1697_v8 = vadd.f32 %v4931_v18, %v6363_v1  ;;  %v6526_v44 = vadd.f32 %v4975_v10, %v1693_v35 }
 0x14a   : > { %v1569_v50 = vpop.f32.mrf.mxu1  ;;  %v1939_v20 = vpop.f32.mrf.mxu0 }
 0x14b   : > { %v1696_v14 = vadd.f32 %v1569_v50, %v6371_v5  ;;  %v6529_v22 = vadd.f32 %v1939_v20, %v1692_v17 }
 0x14c   : > { %v4934_v36 = vpop.f32.mrf.mxu1  ;;  %v4978_v46 = vpop.f32.mrf.mxu0 }
 0x14d   : > { %v1699_v27 = vadd.f32 %v4934_v36, %v6377_v47  ;;  %v6532_v12 = vadd.f32 %v4978_v46, %v1695_v63 }
 0x14e   : > { %v1579_v11 = vpop.f32.mrf.mxu1  ;;  %v1949_v4 = vpop.f32.mrf.mxu0 }
 0x14f   : > { %v1698_v29 = vadd.f32 %v1579_v11, %v6385_v0  ;;  %v6535_v24 = vadd.f32 %v1949_v4, %v1694_v16 }
 0x150   : > { %v4937_v1 = vpop.f32.mrf.mxu1  ;;  %v4981_v31 = vpop.f32.mrf.mxu0 }
 0x151   : > { %v1701_v49 = vadd.f32 %v4937_v1, %v6391_v38  ;;  %v6538_v51 = vadd.f32 %v4981_v31, %v1697_v8 }
 0x152   : > { %v1589_v5 = vpop.f32.mrf.mxu1  ;;  %v1959_v28 = vpop.f32.mrf.mxu0 }
 0x153   : > { %v1700_v33 = vadd.f32 %v1589_v5, %v6398_v26  ;;  %v6541_v37 = vadd.f32 %v1959_v28, %v1696_v14  ;;  %v5326_v14 = vmov 0.0  }
 0x154   : > { %v4940_v47 = vpop.f32.mrf.mxu1  ;;  %v4984_v15 = vpop.f32.mrf.mxu0  ;;  %5215 = vmatprep.subr.mxu1 %v5326_v14  ;;  %5217 = vmatprep.mubr.msk.f32.mxu1 %vm5327_vm2, %v5326_v14 }
 0x155   : > { %v1703_v59 = vadd.f32 %v4940_v47, %v6404_v58  ;;  %v6544_v55 = vadd.f32 %v4984_v15, %v1699_v27 }
 0x156   : > { %v1599_v0 = vpop.f32.mrf.mxu1  ;;  %v1969_v3 = vpop.f32.mrf.mxu0 }
 0x157   : > { %v1702_v35 = vadd.f32 %v1599_v0, %v6412_v30  ;;  %v6547_v56 = vadd.f32 %v1969_v3, %v1698_v29 }
 0x158   : > { %v4943_v38 = vpop.f32.mrf.mxu1  ;;  %v4987_v43 = vpop.f32.mrf.mxu0 }
 0x159   : > { %v1705_v17 = vadd.f32 %v4943_v38, %v6419_v6  ;;  %v6550_v34 = vadd.f32 %v4987_v43, %v1701_v49 }
 0x15a   : > { %v1609_v26 = vpop.f32.mrf.mxu1  ;;  %v1979_v25 = vpop.f32.mrf.mxu0 }
 0x15b   : > { %v1704_v63 = vadd.f32 %v1609_v26, %v6427_v61  ;;  %v6553_v21 = vadd.f32 %v1979_v25, %v1700_v33  ;;  %v3814_v61 = vld [vmem:[%s6902_s3] sm:$0xff] }
 0x15c   : > { %v4946_v58 = vpop.f32.mrf.mxu1  ;;  %v4990_v54 = vpop.f32.mrf.mxu0  ;;  %5216 = vmatpush3.msra.mxu1 %v3814_v61 }
 0x15d   : > { %v1707_v16 = vadd.f32 %v4946_v58, %v6433_v52  ;;  %v6556_v18 = vadd.f32 %v4990_v54, %v1703_v59 }
 0x15e   : > { %v1619_v30 = vpop.f32.mrf.mxu1  ;;  %v1989_v10 = vpop.f32.mrf.mxu0 }
 0x15f   : > { %v1706_v8 = vadd.f32 %v1619_v30, %v6441_v23  ;;  %v6559_v50 = vadd.f32 %v1989_v10, %v1702_v35 }
 0x160   : > { %v4949_v6 = vpop.f32.mrf.mxu1  ;;  %v4993_v20 = vpop.f32.mrf.mxu0 }
 0x161   : > { %v1709_v36 = vadd.f32 %v4949_v6, %v6447_v32  ;;  %v6566_v52 = vadd.f32 %v4993_v20, %v1705_v17 }
 0x162   : > { %v1629_v46 = vpop.f32.mrf.mxu1  ;;  %v1999_v27 = vpop.f32.mrf.mxu0 }
 0x163   : > { %v1708_v23 = vadd.f32 %v1629_v46, %v6455_v62  ;;  %v6569_v11 = vadd.f32 %v1999_v27, %v1704_v63 }
 0x164   : > { %v4952_v4 = vpop.f32.mrf.mxu1  ;;  %v4996_v29 = vpop.f32.mrf.mxu0 }
 0x165   : > { %v1711_v1 = vadd.f32 %v4952_v4, %v6461_v60  ;;  %v6572_v31 = vadd.f32 %v4996_v29, %v1707_v16 }
 0x166   : > { %v1639_v49 = vpop.f32.mrf.mxu1  ;;  %v2009_v5 = vpop.f32.mrf.mxu0 }
 0x167   : > { %v1710_v28 = vadd.f32 %v1639_v49, %v6470_v53  ;;  %v6575_v32 = vadd.f32 %v2009_v5, %v1706_v8 }
 0x168   : > { %v4955_v33 = vpop.f32.mrf.mxu1  ;;  %v4999_v47 = vpop.f32.mrf.mxu0 }
 0x169   : > { %v1713_v15 = vadd.f32 %v4955_v33, %v6476_v39  ;;  %v6578_v59 = vadd.f32 %v4999_v47, %v1709_v36 }
 0x16a   : > { %v1649_v62 = vpop.f32.mrf.mxu1  ;;  %v2019_v0 = vpop.f32.mrf.mxu0 }
 0x16b   : > { %v1712_v3 = vadd.f32 %v1649_v62, %v6483_v41  ;;  %v6581_v35 = vadd.f32 %v2019_v0, %v1708_v23 }
 0x16c   : > { %v4958_v60 = vpop.f32.mrf.mxu1  ;;  %v5002_v38 = vpop.f32.mrf.mxu0 }
 0x16d   : > { %v1715_v43 = vadd.f32 %v4958_v60, %v6488_v45  ;;  %v6584_v17 = vadd.f32 %v5002_v38, %v1711_v1 }
 0x16e   : > { %v1659_v53 = vpop.f32.mrf.mxu1  ;;  %v2029_v26 = vpop.f32.mrf.mxu0 }
 0x16f   : > { %v1714_v25 = vadd.f32 %v1659_v53, %v6494_v7  ;;  %v6587_v63 = vadd.f32 %v2029_v26, %v1710_v28 }
 0x170   : > { %v4961_v39 = vpop.f32.mrf.mxu1  ;;  %v5005_v58 = vpop.f32.mrf.mxu0 }
 0x171   : > { %v1717_v54 = vadd.f32 %v4961_v39, %v6498_v48  ;;  %v6590_v16 = vadd.f32 %v5005_v58, %v1713_v15 }
 0x172   : > { %v1669_v41 = vpop.f32.mrf.mxu1  ;;  %v2039_v30 = vpop.f32.mrf.mxu0 }
 0x173   : > { %v1716_v10 = vadd.f32 %v1669_v41, %v6503_v2  ;;  %v6593_v8 = vadd.f32 %v2039_v30, %v1712_v3 }
 0x174   : > { %v4964_v45 = vpop.f32.mrf.mxu1  ;;  %v5008_v6 = vpop.f32.mrf.mxu0 }
 0x175   : > { %7044 = vst [vmem:[#allocation16_spill] sm:$0xff] %v6593_v8  ;;  %v1719_v20 = vadd.f32 %v4964_v45, %v6507_v13  ;;  %v6596_v61 = vadd.f32 %v5008_v6, %v1715_v43 }
 0x176   : > { %v1679_v7 = vpop.f32.mrf.mxu1  ;;  %v2049_v36 = vpop.f32.mrf.mxu0 }
 0x177   : > { %v1718_v46 = vadd.f32 %v1679_v7, %v6510_v9  ;;  %v6599_v27 = vadd.f32 %v2049_v36, %v1714_v25 }
 0x178   : > { %v5011_v48 = vpop.f32.mrf.mxu0  ;;  %v5019_v23 = vpop.f32.mrf.mxu1 }
 0x179   : > { %7045 = vst [vmem:[#allocation17_spill] sm:$0xff] %v6599_v27  ;;  %v6601_v4 = vadd.f32 %v5011_v48, %v1717_v54  ;;  %v2469_v2 = vadd.f32 %v5019_v23, %v6514_v57 }
 0x17a   : > { %v2059_v29 = vpop.f32.mrf.mxu0  ;;  %v6604_v1 = vpop.f32.mrf.mxu1 }
 0x17b   : > { %v6606_v49 = vadd.f32 %v2059_v29, %v1716_v10 }
 0x17c   : > { %v5014_v13 = vpop.f32.mrf.mxu0  ;;  %v5022_v5 = vpop.f32.mrf.mxu1 }
 0x17d   : > { %7046 = vst [vmem:[#allocation18_spill] sm:$0xff] %v6606_v49  ;;  %v6608_v28 = vadd.f32 %v5014_v13, %v1719_v20  ;;  %v2471_v33 = vadd.f32 %v5022_v5, %v6520_v19 }
 0x17e   : > { %v2069_v9 = vpop.f32.mrf.mxu0  ;;  %v6611_v47 = vpop.f32.mrf.mxu1 }
 0x17f   : > { %v6613_v15 = vadd.f32 %v2069_v9, %v1718_v46 }
 0x180   : > { %v5025_v62 = vpop.f32.mrf.mxu1  ;;  %v5069_v0 = vpop.f32.mrf.mxu0 }
 0x181   : > { %7047 = vst [vmem:[#allocation19_spill] sm:$0xff] %v6613_v15  ;;  %v2473_v57 = vadd.f32 %v5025_v62, %v6526_v44  ;;  %v6616_v3 = vadd.f32 %v5069_v0, %v2469_v2 }
 0x182   : > { %v6618_v60 = vpop.f32.mrf.mxu1  ;;  %v6620_v38 = vpop.f32.mrf.mxu0 }
 0x184   : > { %v5028_v43 = vpop.f32.mrf.mxu1  ;;  %v5072_v53 = vpop.f32.mrf.mxu0 }
 0x185   : > { %v2475_v26 = vadd.f32 %v5028_v43, %v6532_v12  ;;  %v6623_v19 = vadd.f32 %v5072_v53, %v2471_v33 }
 0x186   : > { %v6625_v25 = vpop.f32.mrf.mxu1  ;;  %v6627_v39 = vpop.f32.mrf.mxu0 }
 0x188   : > { %v5031_v58 = vpop.f32.mrf.mxu1  ;;  %v5075_v54 = vpop.f32.mrf.mxu0 }
 0x189   : > { %v2477_v44 = vadd.f32 %v5031_v58, %v6538_v51  ;;  %v6630_v41 = vadd.f32 %v5075_v54, %v2473_v57 }
 0x18a   : > { %v6632_v30 = vpop.f32.mrf.mxu1  ;;  %v6634_v10 = vpop.f32.mrf.mxu0 }
 0x18c   : > { %v5034_v45 = vpop.f32.mrf.mxu1  ;;  %v5078_v6 = vpop.f32.mrf.mxu0 }
 0x18d   : > { %v2479_v12 = vadd.f32 %v5034_v45, %v6544_v55  ;;  %v6637_v20 = vadd.f32 %v5078_v6, %v2475_v26 }
 0x18e   : > { %v6639_v7 = vpop.f32.mrf.mxu1  ;;  %v6641_v36 = vpop.f32.mrf.mxu0 }
 0x190   : > { %v5037_v46 = vpop.f32.mrf.mxu1  ;;  %v5081_v48 = vpop.f32.mrf.mxu0 }
 0x191   : > { %v2481_v51 = vadd.f32 %v5037_v46, %v6550_v34  ;;  %v6644_v23 = vadd.f32 %v5081_v48, %v2477_v44 }
 0x192   : > { %v6646_v2 = vpop.f32.mrf.mxu1  ;;  %v6648_v29 = vpop.f32.mrf.mxu0 }
 0x194   : > { %v5040_v13 = vpop.f32.mrf.mxu1  ;;  %v5084_v5 = vpop.f32.mrf.mxu0 }
 0x195   : > { %v2483_v55 = vadd.f32 %v5040_v13, %v6556_v18  ;;  %v6651_v33 = vadd.f32 %v5084_v5, %v2479_v12 }
 0x196   : > { %v6653_v9 = vpop.f32.mrf.mxu1  ;;  %v6655_v62 = vpop.f32.mrf.mxu0 }
 0x198   : > { %v5043_v0 = vpop.f32.mrf.mxu1  ;;  %v5087_v57 = vpop.f32.mrf.mxu0 }
 0x199   : > { %v2485_v34 = vadd.f32 %v5043_v0, %v6566_v52  ;;  %v6659_v43 = vadd.f32 %v5087_v57, %v2481_v51 }
 0x19a   : > { %v6661_v53 = vpop.f32.mrf.mxu1  ;;  %v6663_v26 = vpop.f32.mrf.mxu0 }
 0x19c   : > { %v5046_v18 = vpop.f32.mrf.mxu1  ;;  %v5090_v58 = vpop.f32.mrf.mxu0 }
 0x19d   : > { %v2487_v54 = vadd.f32 %v5046_v18, %v6572_v31  ;;  %v6666_v44 = vadd.f32 %v5090_v58, %v2483_v55 }
 0x19e   : > { %v6668_v45 = vpop.f32.mrf.mxu1  ;;  %v6670_v6 = vpop.f32.mrf.mxu0 }
 0x1a0   : > { %v5049_v12 = vpop.f32.mrf.mxu1  ;;  %v5093_v14 = vpop.f32.mrf.mxu0 }
 0x1a1   : > { %v2489_v52 = vadd.f32 %v5049_v12, %v6578_v59  ;;  %v6673_v46 = vadd.f32 %v5093_v14, %v2485_v34 }
 0x1a2   : > { %v6675_v48 = vpop.f32.mrf.mxu1  ;;  %v6677_v51 = vpop.f32.mrf.mxu0 }
 0x1a4   : > { %v5052_v13 = vpop.f32.mrf.mxu1  ;;  %v5096_v5 = vpop.f32.mrf.mxu0 }
 0x1a5   : > { %v2491_v31 = vadd.f32 %v5052_v13, %v6584_v17  ;;  %v6680_v55 = vadd.f32 %v5096_v5, %v2487_v54 }
 0x1a6   : > { %v6682_v0 = vpop.f32.mrf.mxu1  ;;  %v6684_v57 = vpop.f32.mrf.mxu0 }
 0x1a7   : > { %7048 = vst [vmem:[#allocation20_spill] sm:$0xff] %v6682_v0 }
 0x1a8   : > { %v5055_v18 = vpop.f32.mrf.mxu1  ;;  %v5099_v58 = vpop.f32.mrf.mxu0 }
 0x1a9   : > { %v2493_v59 = vadd.f32 %v5055_v18, %v6590_v16  ;;  %v6687_v34 = vadd.f32 %v5099_v58, %v2489_v52 }
 0x1aa   : > { %v6689_v12 = vpop.f32.mrf.mxu1  ;;  %v6691_v14 = vpop.f32.mrf.mxu0 }
 0x1ab   : > { %7049 = vst [vmem:[#allocation21_spill] sm:$0xff] %v6689_v12 }
 0x1ac   : > { %v5058_v15 = vpop.f32.mrf.mxu1  ;;  %v5102_v49 = vpop.f32.mrf.mxu0 }
 0x1ad   : > { %v2495_v17 = vadd.f32 %v5058_v15, %v6596_v61  ;;  %v6694_v54 = vadd.f32 %v5102_v49, %v2491_v31 }
 0x1ae   : > { %v6696_v13 = vpop.f32.mrf.mxu1  ;;  %v6698_v5 = vpop.f32.mrf.mxu0 }
 0x1af   : > { %7050 = vst [vmem:[#allocation22_spill] sm:$0xff] %v6694_v54  ;;  %7051 = vst [vmem:[#allocation23_spill] sm:$0xff] %v6696_v13 }
 0x1b0   : > { %7052 = vst [vmem:[#allocation24_spill] sm:$0xff] %v6698_v5  ;;  %v5061_v27 = vpop.f32.mrf.mxu1  ;;  %v5105_v8 = vpop.f32.mrf.mxu0 }
 0x1b1   : > { %v2497_v16 = vadd.f32 %v5061_v27, %v6601_v4  ;;  %v6701_v52 = vadd.f32 %v5105_v8, %v2493_v59 }
 0x1b2   : > { %v6703_v18 = vpop.f32.mrf.mxu1  ;;  %v6705_v58 = vpop.f32.mrf.mxu0 }
 0x1b3   : > { %7053 = vst [vmem:[#allocation25_spill] sm:$0xff] %v6701_v52  ;;  %7054 = vst [vmem:[#allocation26_spill] sm:$0xff] %v6703_v18  ;;  %v2468_v18 = vadd.f32 %v6604_v1, %v6517_v40  ;;  %v2470_v40 = vadd.f32 %v6611_v47, %v6523_v42 }
 0x1b4   : > { %v5064_v12 = vpop.f32.mrf.mxu1  ;;  %v5108_v0 = vpop.f32.mrf.mxu0 }
 0x1b5   : > { %v2499_v61 = vadd.f32 %v5064_v12, %v6608_v28  ;;  %v6708_v49 = vadd.f32 %v5108_v0, %v2495_v17  ;;  %v2859_v12 = vadd.f32 %v6620_v38, %v2468_v18 }
 0x1b6   : > { %v6710_v15 = vpop.f32.mrf.mxu1  ;;  %v6712_v31 = vpop.f32.mrf.mxu0 }
 0x1b7   : > { %7055 = vst [vmem:[#allocation27_spill] sm:$0xff] %v6708_v49  ;;  %7056 = vst [vmem:[#allocation28_spill] sm:$0xff] %v6710_v15 }
 0x1b8   : > { %v5111_v13 = vpop.f32.mrf.mxu0  ;;  %v5119_v54 = vpop.f32.mrf.mxu1 }
 0x1b9   : > { %v6714_v5 = vadd.f32 %v5111_v13, %v2497_v16  ;;  %v3250_v17 = vadd.f32 %v5119_v54, %v6616_v3  ;;  %v6729_v16 = vld [vmem:[%s6901_s2] ss:$0 sm:$0xff]  ;;  %v2861_v3 = vadd.f32 %v6627_v39, %v2470_v40 }
 0x1ba   : > { %v6716_v8 = vpop.f32.mrf.mxu0  ;;  %v3090_v27 = vpop.f32.mrf.mxu1 }
 0x1bb   : > { %7057 = vst [vmem:[#allocation30_spill] sm:$0xff] %v6714_v5  ;;  %7058 = vst [vmem:[#allocation29_spill] sm:$0xff] %v6716_v8  ;;  %v3249_v5 = vadd.f32 %v3090_v27, %v2859_v12 }
 0x1bc   : > { %v5114_v4 = vpop.f32.mrf.mxu0  ;;  %v5122_v59 = vpop.f32.mrf.mxu1 }
 0x1bd   : > { %v6720_v52 = vadd.f32 %v5114_v4, %v2499_v61  ;;  %v3252_v4 = vadd.f32 %v5122_v59, %v6623_v19 }
 0x1be   : > { %v6722_v28 = vpop.f32.mrf.mxu0  ;;  %v3100_v0 = vpop.f32.mrf.mxu1 }
 0x1bf   : > { %7059 = vst [vmem:[#allocation6_spill] sm:$0xff] %v6720_v52  ;;  %7060 = vst [vmem:[#allocation31_spill] sm:$0xff] %v6722_v28  ;;  %v2472_v28 = vadd.f32 %v6618_v60, %v6529_v22 }
 0x1c0   : > { %v5125_v15 = vpop.f32.mrf.mxu1  ;;  %v5169_v13 = vpop.f32.mrf.mxu0 }
 0x1c1   : > { %v3640_v8 = vadd.f32 %v5169_v13, %v3250_v17  ;;  %v3251_v17 = vadd.f32 %v3100_v0, %v2861_v3  ;;  %v2863_v19 = vadd.f32 %v6634_v10, %v2472_v28  ;;  %v2474_v0 = vadd.f32 %v6625_v25, %v6535_v24 }
 0x1c2   : > { %v3110_v1 = vpop.f32.mrf.mxu1  ;;  %v3480_v61 = vpop.f32.mrf.mxu0 }
 0x1c3   : > { %v3679_v38 = vadd.f32 %v6729_v16, %v3640_v8  ;;  %v3639_v18 = vadd.f32 %v3480_v61, %v3249_v5  ;;  %v3254_v8 = vadd.f32 %v5125_v15, %v6630_v41  ;;  %v3253_v60 = vadd.f32 %v3110_v1, %v2863_v19 }
 0x1c4   : > { %v5128_v54 = vpop.f32.mrf.mxu1  ;;  %v5172_v52 = vpop.f32.mrf.mxu0 }
 0x1c5   : > { %v3711_v49 = vmax.f32 %v3679_v38, 0.0  ;;  %v3678_v27 = vadd.f32 %v6729_v16, %v3639_v18  ;;  %v3642_v12 = vadd.f32 %v5172_v52, %v3252_v4  ;;  %v3256_v15 = vadd.f32 %v5128_v54, %v6637_v20 }
 0x1c6   : > { %v3120_v42 = vpop.f32.mrf.mxu1  ;;  %v3490_v47 = vpop.f32.mrf.mxu0  ;;  %v2865_v18 = vadd.f32 %v6641_v36, %v2474_v0 }
 0x1c7   : > { %v3710_v5 = vmax.f32 %v3678_v27, 0.0  ;;  %v3681_v39 = vadd.f32 %v6729_v16, %v3642_v12  ;;  %v3641_v59 = vadd.f32 %v3490_v47, %v3251_v17  ;;  %v3744_v22 = vsel %vm3742_vm3, %v3711_v49, 0.0 }
 0x1c8   : > { %v5131_v13 = vpop.f32.mrf.mxu1  ;;  %v5175_v40 = vpop.f32.mrf.mxu0  ;;  %v2476_v17 = vadd.f32 %v6632_v30, %v6541_v37  ;;  %v3255_v47 = vadd.f32 %v3120_v42, %v2865_v18  ;;  %v2478_v42 = vadd.f32 %v6639_v7, %v6547_v56 }
 0x1c9   : > { %v3743_v61 = vsel %vm3742_vm3, %v3710_v5, 0.0  ;;  %v3644_v52 = vadd.f32 %v5175_v40, %v3254_v8  ;;  %v3680_v10 = vadd.f32 %v6729_v16, %v3641_v59  ;;  %v3713_v3 = vmax.f32 %v3681_v39, 0.0 }
 0x1ca   : > { %v3745_v4 = vadd.f32 %v3744_v22, %v3743_v61  ;;  %v3130_v28 = vpop.f32.mrf.mxu1  ;;  %v3500_v41 = vpop.f32.mrf.mxu0  ;;  %v2867_v54 = vadd.f32 %v6648_v29, %v2476_v17  ;;  %v3258_v5 = vadd.f32 %v5131_v13, %v6644_v23 }
 0x1cb   : > { %v3643_v38 = vadd.f32 %v3500_v41, %v3253_v60  ;;  %v3712_v27 = vmax.f32 %v3680_v10, 0.0  ;;  %v3683_v49 = vadd.f32 %v6729_v16, %v3644_v52  ;;  %v3748_v59 = vsel %vm3742_vm3, %v3713_v3, 0.0 }
 0x1cc   : > { %v5134_v1 = vpop.f32.mrf.mxu1  ;;  %v5178_v12 = vpop.f32.mrf.mxu0  ;;  %v3257_v61 = vadd.f32 %v3130_v28, %v2867_v54  ;;  %v2869_v10 = vadd.f32 %v6655_v62, %v2478_v42 }
 0x1cd   : > { %v3682_v24 = vadd.f32 %v6729_v16, %v3643_v38  ;;  %v3646_v25 = vadd.f32 %v5178_v12, %v3256_v15  ;;  %v3746_v19 = vsel %vm3742_vm3, %v3712_v27, 0.0  ;;  %v3715_v40 = vmax.f32 %v3683_v49, 0.0 }
 0x1ce   : > { %v3140_v8 = vpop.f32.mrf.mxu1  ;;  %v3510_v20 = vpop.f32.mrf.mxu0  ;;  %v3747_v36 = vadd.f32 %v3746_v19, %v3745_v4  ;;  %v3260_v15 = vadd.f32 %v5134_v1, %v6651_v33  ;;  %v2480_v49 = vadd.f32 %v6646_v2, %v6553_v21 }
 0x1cf   : > { %v3714_v39 = vmax.f32 %v3682_v24, 0.0  ;;  %v3685_v22 = vadd.f32 %v6729_v16, %v3646_v25  ;;  %v3645_v37 = vadd.f32 %v3510_v20, %v3255_v47  ;;  %v3752_v18 = vsel %vm3742_vm3, %v3715_v40, 0.0 }
 0x1d0   : > { %v5137_v30 = vpop.f32.mrf.mxu1  ;;  %v5181_v60 = vpop.f32.mrf.mxu0  ;;  %v3749_v52 = vadd.f32 %v3748_v59, %v3747_v36  ;;  %v3259_v62 = vadd.f32 %v3140_v8, %v2869_v10  ;;  %v2871_v47 = vadd.f32 %v6663_v26, %v2480_v49  ;;  %v2482_v8 = vadd.f32 %v6653_v9, %v6559_v50 }
 0x1d1   : > { %v3750_v0 = vsel %vm3742_vm3, %v3714_v39, 0.0  ;;  %v3684_v29 = vadd.f32 %v6729_v16, %v3645_v37  ;;  %v3648_v4 = vadd.f32 %v5181_v60, %v3258_v5  ;;  %v3717_v3 = vmax.f32 %v3685_v22, 0.0 }
 0x1d2   : > { %v3150_v23 = vpop.f32.mrf.mxu1  ;;  %v3520_v13 = vpop.f32.mrf.mxu0  ;;  %v3751_v41 = vadd.f32 %v3750_v0, %v3749_v52  ;;  %v3262_v20 = vadd.f32 %v5137_v30, %v6659_v43  ;;  %v2873_v42 = vadd.f32 %v6670_v6, %v2482_v8  ;;  %v2484_v10 = vadd.f32 %v6661_v53, %v6569_v11 }
 0x1d3   : > { %v3647_v38 = vadd.f32 %v3520_v13, %v3257_v61  ;;  %v3716_v27 = vmax.f32 %v3684_v29, 0.0  ;;  %v3687_v56 = vadd.f32 %v6729_v16, %v3648_v4  ;;  %v3756_v36 = vsel %vm3742_vm3, %v3717_v3, 0.0 }
 0x1d4   : > { %v5140_v7 = vpop.f32.mrf.mxu1  ;;  %v5184_v28 = vpop.f32.mrf.mxu0  ;;  %v3753_v12 = vadd.f32 %v3752_v18, %v3751_v41  ;;  %v3261_v40 = vadd.f32 %v3150_v23, %v2871_v47  ;;  %v2488_v8 = vadd.f32 %v6675_v48, %v6581_v35 }
 0x1d5   : > { %v3686_v17 = vadd.f32 %v6729_v16, %v3647_v38  ;;  %v3650_v24 = vadd.f32 %v5184_v28, %v3260_v15  ;;  %v3754_v25 = vsel %vm3742_vm3, %v3716_v27, 0.0  ;;  %v3719_v5 = vmax.f32 %v3687_v56, 0.0 }
 0x1d6   : > { %v3160_v33 = vpop.f32.mrf.mxu1  ;;  %v3530_v1 = vpop.f32.mrf.mxu0  ;;  %v3755_v19 = vadd.f32 %v3754_v25, %v3753_v12  ;;  %v3264_v52 = vadd.f32 %v5140_v7, %v6666_v44  ;;  %v2875_v27 = vadd.f32 %v6677_v51, %v2484_v10 }
 0x1d7   : > { %v3718_v54 = vmax.f32 %v3686_v17, 0.0  ;;  %v3689_v21 = vadd.f32 %v6729_v16, %v3650_v24  ;;  %v3649_v2 = vadd.f32 %v3530_v1, %v3259_v62  ;;  %v3760_v29 = vsel %vm3742_vm3, %v3719_v5, 0.0 }
 0x1d8   : > { %v5143_v39 = vpop.f32.mrf.mxu1  ;;  %v5187_v59 = vpop.f32.mrf.mxu0  ;;  %v3757_v22 = vadd.f32 %v3756_v36, %v3755_v19  ;;  %v3263_v6 = vadd.f32 %v3160_v33, %v2873_v42  ;;  %v2486_v62 = vadd.f32 %v6668_v45, %v6575_v32 }
 0x1d9   : > { %v3758_v37 = vsel %vm3742_vm3, %v3718_v54, 0.0  ;;  %v3688_v26 = vadd.f32 %v6729_v16, %v3649_v2  ;;  %v3652_v60 = vadd.f32 %v5187_v59, %v3262_v20  ;;  %v3721_v4 = vmax.f32 %v3689_v21, 0.0 }
 0x1da   : > { %v3170_v43 = vpop.f32.mrf.mxu1  ;;  %v3540_v30 = vpop.f32.mrf.mxu0  ;;  %v3759_v61 = vadd.f32 %v3758_v37, %v3757_v22  ;;  %v3266_v7 = vadd.f32 %v5143_v39, %v6673_v46  ;;  %v2877_v20 = vadd.f32 %v6684_v57, %v2486_v62 }
 0x1db   : > { %v3651_v0 = vadd.f32 %v3540_v30, %v3261_v40  ;;  %v3720_v13 = vmax.f32 %v3688_v26, 0.0  ;;  %v3691_v50 = vadd.f32 %v6729_v16, %v3652_v60  ;;  %v3764_v49 = vsel %vm3742_vm3, %v3721_v4, 0.0 }
 0x1dc   : > { %v5146_v9 = vpop.f32.mrf.mxu1  ;;  %v5190_v23 = vpop.f32.mrf.mxu0  ;;  %v3761_v41 = vadd.f32 %v3760_v29, %v3759_v61  ;;  %v3265_v25 = vadd.f32 %v3170_v43, %v2875_v27  ;;  %v2879_v43 = vadd.f32 %v6691_v14, %v2488_v8  ;;  %v7068_v8 = vld [vmem:[#allocation23_spill] sm:$0xff] }
 0x1dd   : > { %v3690_v15 = vadd.f32 %v6729_v16, %v3651_v0  ;;  %v3654_v38 = vadd.f32 %v5190_v23, %v3264_v52  ;;  %v3762_v18 = vsel %vm3742_vm3, %v3720_v13, 0.0  ;;  %v3723_v12 = vmax.f32 %v3691_v50, 0.0  ;;  %v7061_v13 = vld [vmem:[#allocation20_spill] sm:$0xff] }
 0x1de   : > { %v3180_v44 = vpop.f32.mrf.mxu1  ;;  %v3550_v3 = vpop.f32.mrf.mxu0  ;;  %v3763_v56 = vadd.f32 %v3762_v18, %v3761_v41  ;;  %v3268_v36 = vadd.f32 %v5146_v9, %v6680_v55  ;;  %v2490_v50 = vadd.f32 %v7061_v13, %v6587_v63  ;;  %v7070_v13 = vld [vmem:[#allocation18_spill] sm:$0xff] }
 0x1df   : > { %v3722_v28 = vmax.f32 %v3690_v15, 0.0  ;;  %v3693_v11 = vadd.f32 %v6729_v16, %v3654_v38  ;;  %v3653_v53 = vadd.f32 %v3550_v3, %v3263_v6  ;;  %v3768_v21 = vsel %vm3742_vm3, %v3723_v12, 0.0  ;;  %v7062_v38 = vld [vmem:[#allocation24_spill] sm:$0xff] }
 0x1e0   : > { %v5149_v17 = vpop.f32.mrf.mxu1  ;;  %v5193_v24 = vpop.f32.mrf.mxu0  ;;  %v3765_v33 = vadd.f32 %v3764_v49, %v3763_v56  ;;  %v3267_v57 = vadd.f32 %v3180_v44, %v2877_v20  ;;  %v2881_v6 = vadd.f32 %v7062_v38, %v2490_v50  ;;  %v7063_v44 = vld [vmem:[#allocation22_spill] sm:$0xff]  ;;  %v7066_v20 = vld [vmem:[#allocation25_spill] sm:$0xff] }
 0x1e1   : > { %v3766_v1 = vsel %vm3742_vm3, %v3722_v28, 0.0  ;;  %v3692_v51 = vadd.f32 %v6729_v16, %v3653_v53  ;;  %v3656_v47 = vadd.f32 %v5193_v24, %v3266_v7  ;;  %v3725_v2 = vmax.f32 %v3693_v11, 0.0  ;;  %v7064_v11 = vld [vmem:[#allocation16_spill] sm:$0xff]  ;;  %v7065_v53 = vld [vmem:[#allocation21_spill] sm:$0xff]  ;;  %v7071_v50 = vld [vmem:[#allocation26_spill] sm:$0xff] }
 0x1e2   : > { %v3190_v46 = vpop.f32.mrf.mxu1  ;;  %v3560_v19 = vpop.f32.mrf.mxu0  ;;  %v3767_v54 = vadd.f32 %v3766_v1, %v3765_v33  ;;  %v3270_v42 = vadd.f32 %v5149_v17, %v6687_v34  ;;  %v2492_v17 = vadd.f32 %v7065_v53, %v7064_v11 }
 0x1e3   : > { %v3655_v5 = vadd.f32 %v3560_v19, %v3265_v25  ;;  %v3724_v39 = vmax.f32 %v3692_v51, 0.0  ;;  %v3695_v32 = vadd.f32 %v6729_v16, %v3656_v47  ;;  %v3772_v52 = vsel %vm3742_vm3, %v3725_v2, 0.0 }
 0x1e4   : > { %v5152_v45 = vpop.f32.mrf.mxu1  ;;  %v5196_v59 = vpop.f32.mrf.mxu0  ;;  %v3769_v40 = vadd.f32 %v3768_v21, %v3767_v54  ;;  %v3269_v9 = vadd.f32 %v3190_v46, %v2879_v43  ;;  %v2883_v46 = vadd.f32 %v6705_v58, %v2492_v17 }
 0x1e5   : > { %v3694_v22 = vadd.f32 %v6729_v16, %v3655_v5  ;;  %v3658_v37 = vadd.f32 %v5196_v59, %v3268_v36  ;;  %v3770_v26 = vsel %vm3742_vm3, %v3724_v39, 0.0  ;;  %v3727_v0 = vmax.f32 %v3695_v32, 0.0  ;;  %v7067_v59 = vld [vmem:[#allocation17_spill] sm:$0xff] }
 0x1e6   : > { %v3200_v55 = vpop.f32.mrf.mxu1  ;;  %v3570_v60 = vpop.f32.mrf.mxu0  ;;  %v3771_v30 = vadd.f32 %v3770_v26, %v3769_v40  ;;  %v3272_v3 = vadd.f32 %v5152_v45, %v7063_v44  ;;  %v2494_v40 = vadd.f32 %v7068_v8, %v7067_v59 }
 0x1e7   : > { %v3726_v61 = vmax.f32 %v3694_v22, 0.0  ;;  %v3697_v35 = vadd.f32 %v6729_v16, %v3658_v37  ;;  %v3657_v48 = vadd.f32 %v3570_v60, %v3267_v57  ;;  %v3776_v56 = vsel %vm3742_vm3, %v3727_v0, 0.0 }
 0x1e8   : > { %v5155_v29 = vpop.f32.mrf.mxu1  ;;  %v5199_v4 = vpop.f32.mrf.mxu0  ;;  %v3773_v23 = vadd.f32 %v3772_v52, %v3771_v30  ;;  %v3271_v33 = vadd.f32 %v3200_v55, %v2881_v6  ;;  %v2885_v60 = vadd.f32 %v6712_v31, %v2494_v40  ;;  %v7069_v30 = vld [vmem:[#allocation27_spill] sm:$0xff] }
 0x1e9   : > { %v3774_v10 = vsel %vm3742_vm3, %v3726_v61, 0.0  ;;  %v3696_v14 = vadd.f32 %v6729_v16, %v3657_v48  ;;  %v3660_v41 = vadd.f32 %v5199_v4, %v3270_v42  ;;  %v3729_v7 = vmax.f32 %v3697_v35, 0.0  ;;  %v7072_v31 = vld [vmem:[#allocation19_spill] sm:$0xff] }
 0x1ea   : > { %v3210_v34 = vpop.f32.mrf.mxu1  ;;  %v3580_v15 = vpop.f32.mrf.mxu0  ;;  %v3775_v18 = vadd.f32 %v3774_v10, %v3773_v23  ;;  %v3274_v54 = vadd.f32 %v5155_v29, %v7066_v20 }
 0x1eb   : > { %v3659_v27 = vadd.f32 %v3580_v15, %v3269_v9  ;;  %v3728_v28 = vmax.f32 %v3696_v14, 0.0  ;;  %v3699_v63 = vadd.f32 %v6729_v16, %v3660_v41  ;;  %v3780_v5 = vsel %vm3742_vm3, %v3729_v7, 0.0  ;;  %v7073_v41 = vld [vmem:[#allocation28_spill] sm:$0xff] }
 0x1ec   : > { %v5158_v49 = vpop.f32.mrf.mxu1  ;;  %v5202_v12 = vpop.f32.mrf.mxu0  ;;  %v3777_v24 = vadd.f32 %v3776_v56, %v3775_v18  ;;  %v3273_v22 = vadd.f32 %v3210_v34, %v2883_v46  ;;  %v2496_v9 = vadd.f32 %v7071_v50, %v7070_v13  ;;  %v2498_v34 = vadd.f32 %v7073_v41, %v7072_v31  ;;  %v7074_v18 = vld [vmem:[#allocation29_spill] sm:$0xff] }
 0x1ed   : > { %v3698_v62 = vadd.f32 %v6729_v16, %v3659_v27  ;;  %v3662_v25 = vadd.f32 %v5202_v12, %v3272_v3  ;;  %v3778_v1 = vsel %vm3742_vm3, %v3728_v28, 0.0  ;;  %v3731_v21 = vmax.f32 %v3699_v63, 0.0  ;;  %v7075_v27 = vld [vmem:[#allocation30_spill] sm:$0xff] }
 0x1ee   : > { %v3220_v51 = vpop.f32.mrf.mxu1  ;;  %v3590_v47 = vpop.f32.mrf.mxu0  ;;  %v3779_v19 = vadd.f32 %v3778_v1, %v3777_v24  ;;  %v3276_v42 = vadd.f32 %v5158_v49, %v7069_v30  ;;  %v2887_v44 = vadd.f32 %v7074_v18, %v2496_v9 }
 0x1ef   : > { %v3730_v36 = vmax.f32 %v3698_v62, 0.0  ;;  %v3701_v2 = vadd.f32 %v6729_v16, %v3662_v25  ;;  %v3661_v39 = vadd.f32 %v3590_v47, %v3271_v33  ;;  %v3784_v0 = vsel %vm3742_vm3, %v3731_v21, 0.0 }
 0x1f0   : > { %v5161_v32 = vpop.f32.mrf.mxu1  ;;  %v5205_v45 = vpop.f32.mrf.mxu0  ;;  %v3781_v37 = vadd.f32 %v3780_v5, %v3779_v19  ;;  %v3275_v15 = vadd.f32 %v3220_v51, %v2885_v60  ;;  %v7076_v51 = vld [vmem:[#allocation31_spill] sm:$0xff]  ;;  %v7077_v19 = vld [vmem:[#allocation6_spill] sm:$0xff] }
 0x1f1   : > { %v3782_v57 = vsel %vm3742_vm3, %v3730_v36, 0.0  ;;  %v3700_v58 = vadd.f32 %v6729_v16, %v3661_v39  ;;  %v3664_v26 = vadd.f32 %v5205_v45, %v3274_v54  ;;  %v3733_v35 = vmax.f32 %v3701_v2, 0.0 }
 0x1f2   : > { %v3600_v55 = vpop.f32.mrf.mxu0  ;;  %v3783_v43 = vadd.f32 %v3782_v57, %v3781_v37  ;;  %v3230_v61 = vpop.f32.mrf.mxu1  ;;  %v3278_v56 = vadd.f32 %v5161_v32, %v7075_v27  ;;  %v2889_v47 = vadd.f32 %v7076_v51, %v2498_v34 }
 0x1f3   : > { %v3663_v52 = vadd.f32 %v3600_v55, %v3273_v22  ;;  %v3732_v48 = vmax.f32 %v3700_v58, 0.0  ;;  %v3703_v29 = vadd.f32 %v6729_v16, %v3664_v26  ;;  %v3788_v63 = vsel %vm3742_vm3, %v3733_v35, 0.0 }
 0x1f4   : > { %v5208_v4 = vpop.f32.mrf.mxu0  ;;  %v3785_v23 = vadd.f32 %v3784_v0, %v3783_v43  ;;  %v5164_v28 = vpop.f32.mrf.mxu1  ;;  %v3277_v17 = vadd.f32 %v3230_v61, %v2887_v44 }
 0x1f5   : > { %v3702_v10 = vadd.f32 %v6729_v16, %v3663_v52  ;;  %v3666_v14 = vadd.f32 %v5208_v4, %v3276_v42  ;;  %v3786_v38 = vsel %vm3742_vm3, %v3732_v48, 0.0  ;;  %v3735_v49 = vmax.f32 %v3703_v29, 0.0 }
 0x1f6   : > { %v3610_v6 = vpop.f32.mrf.mxu0  ;;  %v3787_v3 = vadd.f32 %v3786_v38, %v3785_v23  ;;  %v3280_v20 = vadd.f32 %v5164_v28, %v7077_v19  ;;  %v3240_v54 = vpop.f32.mrf.mxu1 }
 0x1f7   : > { %v3734_v7 = vmax.f32 %v3702_v10, 0.0  ;;  %v3705_v12 = vadd.f32 %v6729_v16, %v3666_v14  ;;  %v3665_v11 = vadd.f32 %v3610_v6, %v3275_v15  ;;  %v3792_v5 = vsel %vm3742_vm3, %v3735_v49, 0.0  ;;  %v3815_v15 = vld [vmem:[%s6903_s4] sm:$0x1] }
 0x1f8   : > { %v5211_v53 = vpop.f32.mrf.mxu0  ;;  %v3789_v24 = vadd.f32 %v3788_v63, %v3787_v3  ;;  %v3279_v40 = vadd.f32 %v3240_v54, %v2889_v47 }
 0x1f9   : > { %v3790_v62 = vsel %vm3742_vm3, %v3734_v7, 0.0  ;;  %v3668_v25 = vadd.f32 %v5211_v53, %v3278_v56  ;;  %v3704_v33 = vadd.f32 %v6729_v16, %v3665_v11  ;;  %v3737_v21 = vmax.f32 %v3705_v12, 0.0 }
 0x1fa   : > { %v3620_v1 = vpop.f32.mrf.mxu0  ;;  %v3791_v46 = vadd.f32 %v3790_v62, %v3789_v24 }
 0x1fb   : > { %v3667_v36 = vadd.f32 %v3620_v1, %v3277_v17  ;;  %v3736_v2 = vmax.f32 %v3704_v33, 0.0  ;;  %v3707_v39 = vadd.f32 %v6729_v16, %v3668_v25  ;;  %v3796_v26 = vsel %vm3742_vm3, %v3737_v21, 0.0 }
 0x1fc   : > { %v5214_v32 = vpop.f32.mrf.mxu0  ;;  %v3793_v45 = vadd.f32 %v3792_v5, %v3791_v46 }
 0x1fd   : > { %v3706_v59 = vadd.f32 %v6729_v16, %v3667_v36  ;;  %v3670_v8 = vadd.f32 %v5214_v32, %v3280_v20  ;;  %v3794_v22 = vsel %vm3742_vm3, %v3736_v2, 0.0  ;;  %v3739_v55 = vmax.f32 %v3707_v39, 0.0 }
 0x1fe   : > { %v3630_v37 = vpop.f32.mrf.mxu0  ;;  %v3795_v57 = vadd.f32 %v3794_v22, %v3793_v45 }
 0x1ff   : > { %v3738_v58 = vmax.f32 %v3706_v59, 0.0  ;;  %v3709_v60 = vadd.f32 %v6729_v16, %v3670_v8  ;;  %v3669_v43 = vadd.f32 %v3630_v37, %v3279_v40  ;;  %v3800_v0 = vsel %vm3742_vm3, %v3739_v55, 0.0 }
 0x200   : > { %v3797_v30 = vadd.f32 %v3796_v26, %v3795_v57 }
 0x201   : > { %v3798_v42 = vsel %vm3742_vm3, %v3738_v58, 0.0  ;;  %v3708_v61 = vadd.f32 %v6729_v16, %v3669_v43  ;;  %v3741_v35 = vmax.f32 %v3709_v60, 0.0 }
 0x202   : > { %v3799_v52 = vadd.f32 %v3798_v42, %v3797_v30 }
 0x203   : > { %v3740_v48 = vmax.f32 %v3708_v61, 0.0  ;;  %v3804_v50 = vsel %vm3742_vm3, %v3741_v35, 0.0 }
 0x204   : > { %v3801_v29 = vadd.f32 %v3800_v0, %v3799_v52 }
 0x205   : > { %v3802_v4 = vsel %vm3742_vm3, %v3740_v48, 0.0 }
 0x206   : > { %v3803_v13 = vadd.f32 %v3802_v4, %v3801_v29 }
 0x208   : > { %v3805_v9 = vadd.f32 %v3804_v50, %v3803_v13 }
 0x20a   : > { %v3806_v23 = vrot.slane %v3805_v9, 4 }
 0x20c   : > { %v3807_v10 = vadd.f32 %v3806_v23, %v3805_v9 }
 0x20e   : > { %v3808_v14 = vrot.slane %v3807_v10, 2 }
 0x210   : > { %v3809_v31 = vadd.f32 %v3808_v14, %v3807_v10 }
 0x212   : > { %v3810_v41 = vrot.slane %v3809_v31, 1 }
 0x214   : > { %v3811_v16 = vadd.f32 %v3810_v41, %v3809_v31 }
 0x216   : > { %v3813_v34 = vmul.f32 0.00390625, %v3811_v16 }
 0x218   : > { %5218 = vmatmul.mubr.msk.f32.vlgmr.msra.gmra.mxu1 %vm3742_vm3, %v3813_v34 }
 0x2d8   : > { %v3885_v38 = vpop.f32.mrf.mxu1 }
 0x2d9   : > { %v3886_v6 = vadd.f32 %v3885_v38, %v3815_v15 }
 0x2da   : > { %v5219_v18 = vpop.f32.mrf.mxu1 }
 0x2db   : > { %3890 = vst.msk [vmem:[%s216_s26] sm:$0x1] %vm3889_vm4, %v3886_v6 }
 0x2dc   : > { %5277 = shalt.err (!%p5274_p3)
}
 0x2dd   : > { %s5278_s13 = scalar_lea.hbm %s6864_s8, 16  ;;  %s5282_s16 = scalar_lea.hbm %s6904_s5, 32 }
 0x2de   : > { %p5279_p4 = scmp.ne.s32.totalorder %s6864_s8, %s5278_s13  ;;  %p5283_p9 = scmp.lt.s32.totalorder %s6864_s8, %s6904_s5 }
 0x2df   : > { %p5284_p10 = scmp.lt.s32.totalorder %s5282_s16, %s5278_s13 }
 0x2e0   : > { %p5280_p7 = pnand %p5279_p4, %p5397_p5 }
 0x2e1   : > { %p5285_p11 = por %p5284_p10, %p5283_p9 }
 0x2e2   : > { %p5281_p8 = pneg %p5280_p7 }
 0x2e4   : > { %p5286_p12 = pnand %p5285_p11, %p5281_p8 }
 0x2e6   : > { %5289 = shalt.err (!%p5286_p12)
}
 0x2e7   : > { %5223 = dma.vmem_to_hbm [thread:$0]  (%p5397_p5), %s3905_s30, 16, %s6864_s8, %s3892_s9  }
 0x2e8 PF: > { %p5229_p13 = scmp.ge.s32.totalorder %s5324_s21, 2  ;;  %s3916_s25 = sand.u32 1, %s5312_s18  }
 0x2e9   : > { %s3917_s26 = scalar_lea.sflag [#allocation3], %s3916_s25 }
 0x2ea   : > { %p5226_p0 = pnand %p5229_p13, %p5401_p6 }
 0x2ec   : > { %p5227_p1 = pneg %p5226_p0 }
 0x2ee   : > { %5307 = dma.done.wait (%p5227_p1), %s3917_s26, 16  }
 0x2ef   : > { %5309 = vsyncadd (%p5227_p1), %s3917_s26, 4294967280  ;;  %p15_p2 = scmp.ge.s32.totalorder %s5384_s24, 4   ;;  %s7078_s18 = smov %s5316_s19 }
 0x2f0   : > { %s7079_s19 = smov %s5320_s20  ;;  %s7080_s20 = smov %s5395_s27 }
 0x2f1   : > { %s7081_s21 = smov %s5384_s24  ;;  %17 = sbr.rel (!%p15_p2) target bundleno = 3 (0x3), region = 85 }
 0x2f6   :  { %3921 = vsyncpa [#allocation3], 1 }
 0x2f7   :  { %3923 = vsyncpa [#allocation3 + $0x1], 1 }

</bundles_post_ra>
